<compile_context>
chip_gen: v7x
topology: tpu7x:2x2x1
jax: 0.10.0
libtpu: 0.0.40
codegen_flags: <defaults>
</compile_context>

<pallas_src>
import functools

import jax
import jax.numpy as jnp
from jax.experimental import pallas as pl
from jax.experimental.pallas import tpu as pltpu


def _round_up(x, m):
    return ((x + m - 1) // m) * m


def _vmem_capacity_bytes():
    try:
        return int(pltpu.get_tpu_info().vmem_capacity_bytes)
    except Exception:
        return 64 * 1024 * 1024  # conservative default (v7x per-core VMEM)


def _resident_spec(block_shape, index_map):
    """Grid-invariant operand: constant index_map, single-buffered."""
    try:
        return pl.BlockSpec(block_shape, index_map, pipeline_mode=pl.Buffered(1))
    except Exception:  # API variant without pipeline_mode: fall back to default
        return pl.BlockSpec(block_shape, index_map)


def _unpatchify_kernel(x_ref, w_ref, b_ref, o_ref, *, t_h, n_W, C, pH, pW):
    # x_ref: (1, t_h*n_W, E)  activations for t_h patch-rows of one image
    # w_ref: (E, D)           resident projection weight, D = C*pH*pW
    # b_ref: (1, D)           resident bias
    # o_ref: (1, C, t_h, pH, n_W, pW)  NCHW-ordered output block
    y = jnp.dot(x_ref[0], w_ref[...], preferred_element_type=jnp.float32)
    y = (y + b_ref[...]).astype(o_ref.dtype)          # (t_h*n_W, D)

    # Patch -> image scatter, fully in VMEM.  Static loops unroll into plain
    # 2-D slices + sub-block stores (no in-kernel transpose, no HBM round trip):
    #   out[c, t, ph, w, pw] = y[t*n_W + w, (c*pH + ph)*pW + pw]
    for t in range(t_h):
        y_t = y[t * n_W:(t + 1) * n_W, :] if t_h > 1 else y   # (n_W, D)
        for c in range(C):
            for ph in range(pH):
                col = (c * pH + ph) * pW
                o_ref[0, c, t, ph, :, :] = y_t[:, col:col + pW]


def _unpatchify_forward(x, w_t, b2d, *, n_H, n_W, C, pH, pW):
    B, N, E = x.shape
    D = C * pH * pW
    assert N == n_H * n_W
    assert w_t.shape == (E, D) and b2d.shape == (1, D)

    itemsize = 4  # all operands are float32
    vmem_cap = _vmem_capacity_bytes()
    budget = int(0.6 * vmem_cap)

    def vmem_need(th):
        rows = th * n_W
        x_blk = _round_up(rows, 8) * _round_up(E, 128) * itemsize       # 2x buffered
        w_res = _round_up(E, 8) * _round_up(D, 128) * itemsize          # Buffered(1)
        b_res = 8 * _round_up(D, 128) * itemsize                        # Buffered(1)
        o_blk = C * th * pH * _round_up(n_W, 8) * _round_up(pW, 128) * itemsize
        y_tmp = _round_up(rows, 8) * _round_up(D, 128) * itemsize
        return 2 * x_blk + w_res + b_res + 2 * o_blk + y_tmp

    # Legal band heights: th divides n_H, and the x block's sublane extent
    # (th*n_W) is a multiple of 8 or spans all patches (block == full dim).
    legal = [th for th in range(1, n_H + 1)
             if n_H % th == 0 and ((th * n_W) % 8 == 0 or th == n_H)]
    fits = [th for th in legal
            if vmem_need(th) <= budget and th * C * pH <= 1024]
    pool = fits if fits else [min(legal)]
    # Prefer >= 2 total grid steps so v7x's second TensorCore has work.
    multi = [th for th in pool if B * (n_H // th) >= 2]
    t_h = max(multi) if multi else max(pool)

    vmem_limit = min(int(0.9 * vmem_cap),
                     max(vmem_need(t_h) + (4 << 20), 32 << 20))

    grid = (B, n_H // t_h)
    kernel = functools.partial(_unpatchify_kernel,
                               t_h=t_h, n_W=n_W, C=C, pH=pH, pW=pW)

    out6 = pl.pallas_call(
        kernel,
        out_shape=jax.ShapeDtypeStruct((B, C, n_H, pH, n_W, pW), x.dtype),
        grid=grid,
        in_specs=[
            pl.BlockSpec((1, t_h * n_W, E), lambda b, h: (b, h, 0)),
            _resident_spec((E, D), lambda b, h: (0, 0)),
            _resident_spec((1, D), lambda b, h: (0, 0)),
        ],
        out_specs=pl.BlockSpec((1, C, t_h, pH, n_W, pW),
                               lambda b, h: (b, 0, h, 0, 0, 0)),
        compiler_params=pltpu.CompilerParams(
            dimension_semantics=("parallel", "parallel"),
            vmem_limit_bytes=vmem_limit,
        ),
        cost_estimate=pl.CostEstimate(
            flops=2 * B * N * E * D,
            transcendentals=0,
            bytes_accessed=(B * N * E + E * D + D + B * N * D) * itemsize,
        ),
    )(x, w_t, b2d)

    # (B, C, n_H, pH, n_W, pW) -> (B, C, H, W): adjacent-dim merge, free reshape.
    return out6.reshape(B, C, n_H * pH, n_W * pW)


class UnpatchifyPallas:
    """JAX/Pallas port of the PyTorch Unpatchify module."""

    def __init__(self, patch_size_H, patch_size_W, input_dim, embed_dim,
                 img_H, img_W, key):
        self.patch_size_H = patch_size_H
        self.patch_size_W = patch_size_W
        self.input_dim = input_dim
        self.embed_dim = embed_dim
        self.img_H = img_H
        self.img_W = img_W
        self.n_H = img_H // patch_size_H
        self.n_W = img_W // patch_size_W
        self.n_patches = self.n_H * self.n_W

        out_dim = input_dim * patch_size_H * patch_size_W
        kw, kb = jax.random.split(key)
        # torch.nn.Linear default init: U(-1/sqrt(in_features), 1/sqrt(in_features)).
        bound = 1.0 / (embed_dim ** 0.5)
        # torch stores (out_dim, embed_dim); keep the (embed_dim, out_dim)
        # transpose resident so the kernel computes x @ W^T directly.
        self.weight_t = jax.random.uniform(
            kw, (embed_dim, out_dim), jnp.float32, -bound, bound)
        self.bias = jax.random.uniform(
            kb, (out_dim,), jnp.float32, -bound, bound)
        self.bias2d = self.bias.reshape(1, out_dim)

        self._forward = jax.jit(functools.partial(
            _unpatchify_forward,
            n_H=self.n_H, n_W=self.n_W,
            C=input_dim, pH=patch_size_H, pW=patch_size_W))

    def __call__(self, x):
        # x: (B, N_patches, embed_dim) -> (B, C, H, W)
        assert x.ndim == 3, f"Expected 3D (B, N_patches, embed_dim), got {x.ndim}D"
        assert x.shape[1] == self.n_patches, (x.shape, self.n_patches)
        assert x.shape[2] == self.embed_dim, (x.shape, self.embed_dim)
        return self._forward(x, self.weight_t, self.bias2d)


if __name__ == "__main__":
    key = jax.random.PRNGKey(0)
    k_param, k_x = jax.random.split(key)

    # Small shapes: B=2, embed_dim=32, C=4, patch 4x4, image 16x16 -> 16 patches.
    patch_H, patch_W = 4, 4
    C, E = 4, 32
    img_H, img_W = 16, 16
    B = 2

    module = UnpatchifyPallas(patch_H, patch_W, C, E, img_H, img_W, k_param)

    n_patches = (img_H // patch_H) * (img_W // patch_W)
    x = jax.random.normal(k_x, (B, n_patches, E), dtype=jnp.float32)

    out = jax.block_until_ready(module(x))

    # Reference in plain JAX (high-precision matmul to avoid MXU-pass mismatch).
    y_ref = jnp.dot(x.reshape(B * n_patches, E), module.weight_t,
                    precision=jax.lax.Precision.HIGHEST) + module.bias
    y_ref = y_ref.reshape(B, img_H // patch_H, img_W // patch_W, C, patch_H, patch_W)
    y_ref = jnp.transpose(y_ref, (0, 3, 1, 4, 2, 5)).reshape(B, C, img_H, img_W)

    assert out.shape == (B, C, img_H, img_W), out.shape
    assert jnp.allclose(out, y_ref, atol=1e-4, rtol=1e-4)

    print("KERNEL_OK")
</pallas_src>

<mosaic_0001>
module attributes {stable_mosaic.version = 11 : i64} {
  func.func @_unpatchify_kernel(%arg0: i32, %arg1: i32, %arg2: memref<1x16x32xf32, #tpu.memory_space<vmem>>, %arg3: memref<32x64xf32, #tpu.memory_space<vmem>>, %arg4: memref<1x64xf32, #tpu.memory_space<vmem>>, %arg5: memref<1x4x4x4x4x4xf32, #tpu.memory_space<vmem>>) attributes {dimension_semantics = [#tpu.dimension_semantics<parallel>, #tpu.dimension_semantics<parallel>], iteration_bounds = array<i64: 2, 1>, scalar_prefetch = 0 : i64, scratch_operands = 0 : i64, tpu.core_type = #tpu.core_type<tc>, window_params = [{transform_indices = @transform_0, window_bounds = array<i64: 1, 16, 32>}, {pipeline_mode = #tpu.pipeline_mode<synchronous>, transform_indices = @transform_1, window_bounds = array<i64: 32, 64>}, {pipeline_mode = #tpu.pipeline_mode<synchronous>, transform_indices = @transform_2, window_bounds = array<i64: 1, 64>}, {transform_indices = @transform_3, window_bounds = array<i64: 1, 4, 4, 4, 4, 4>}]} {
    %c0 = arith.constant 0 : index
    %c0_0 = arith.constant 0 : index
    %c0_1 = arith.constant 0 : index
    %0 = vector.load %arg2[%c0, %c0_0, %c0_1] : memref<1x16x32xf32, #tpu.memory_space<vmem>>, vector<1x16x32xf32>
    %1 = vector.shape_cast %0 : vector<1x16x32xf32> to vector<16x32xf32>
    %c0_2 = arith.constant 0 : index
    %c0_3 = arith.constant 0 : index
    %2 = vector.load %arg3[%c0_2, %c0_3] : memref<32x64xf32, #tpu.memory_space<vmem>>, vector<32x64xf32>
    %cst = arith.constant dense<0.000000e+00> : vector<16x64xf32>
    %3 = tpu.matmul %1, %2, %cst {dimension_numbers = #tpu.dot_dimension_numbers<[1], [0], [0], [1], [0, 0, 1, 1], [], []>} : vector<16x32xf32>, vector<32x64xf32>, vector<16x64xf32> -> vector<16x64xf32>
    %c0_4 = arith.constant 0 : index
    %c0_5 = arith.constant 0 : index
    %4 = vector.load %arg4[%c0_4, %c0_5] : memref<1x64xf32, #tpu.memory_space<vmem>>, vector<1x64xf32>
    %5 = vector.broadcast %4 : vector<1x64xf32> to vector<16x64xf32>
    %6 = arith.addf %3, %5 : vector<16x64xf32>
    %7 = vector.extract_strided_slice %6 {offsets = [0, 0], sizes = [4, 64], strides = [1, 1]} : vector<16x64xf32> to vector<4x64xf32>
    %8 = vector.extract_strided_slice %7 {offsets = [0, 0], sizes = [4, 4], strides = [1, 1]} : vector<4x64xf32> to vector<4x4xf32>
    %c0_6 = arith.constant 0 : index
    %c0_7 = arith.constant 0 : index
    %c0_8 = arith.constant 0 : index
    %c0_9 = arith.constant 0 : index
    %c0_10 = arith.constant 0 : index
    %c0_11 = arith.constant 0 : index
    %9 = vector.load %arg5[%c0_6, %c0_7, %c0_8, %c0_9, %c0_10, %c0_11] : memref<1x4x4x4x4x4xf32, #tpu.memory_space<vmem>>, vector<1x1x1x1x4x4xf32>
    %10 = vector.shape_cast %9 : vector<1x1x1x1x4x4xf32> to vector<4x4xf32>
    %11 = vector.shape_cast %8 : vector<4x4xf32> to vector<1x1x1x1x4x4xf32>
    tpu.vector_store %arg5[%c0_6, %c0_7, %c0_8, %c0_9, %c0_10, %c0_11], %11 {strides = array<i32>} : memref<1x4x4x4x4x4xf32, #tpu.memory_space<vmem>>, vector<1x1x1x1x4x4xf32>,
    %12 = vector.extract_strided_slice %7 {offsets = [0, 4], sizes = [4, 4], strides = [1, 1]} : vector<4x64xf32> to vector<4x4xf32>
    %c0_12 = arith.constant 0 : index
    %c0_13 = arith.constant 0 : index
    %c0_14 = arith.constant 0 : index
    %c1 = arith.constant 1 : index
    %c0_15 = arith.constant 0 : index
    %c0_16 = arith.constant 0 : index
    %13 = vector.load %arg5[%c0_12, %c0_13, %c0_14, %c1, %c0_15, %c0_16] : memref<1x4x4x4x4x4xf32, #tpu.memory_space<vmem>>, vector<1x1x1x1x4x4xf32>
    %14 = vector.shape_cast %13 : vector<1x1x1x1x4x4xf32> to vector<4x4xf32>
    %15 = vector.shape_cast %12 : vector<4x4xf32> to vector<1x1x1x1x4x4xf32>
    tpu.vector_store %arg5[%c0_12, %c0_13, %c0_14, %c1, %c0_15, %c0_16], %15 {strides = array<i32>} : memref<1x4x4x4x4x4xf32, #tpu.memory_space<vmem>>, vector<1x1x1x1x4x4xf32>,
    %16 = vector.extract_strided_slice %7 {offsets = [0, 8], sizes = [4, 4], strides = [1, 1]} : vector<4x64xf32> to vector<4x4xf32>
    %c0_17 = arith.constant 0 : index
    %c0_18 = arith.constant 0 : index
    %c0_19 = arith.constant 0 : index
    %c2 = arith.constant 2 : index
    %c0_20 = arith.constant 0 : index
    %c0_21 = arith.constant 0 : index
    %17 = vector.load %arg5[%c0_17, %c0_18, %c0_19, %c2, %c0_20, %c0_21] : memref<1x4x4x4x4x4xf32, #tpu.memory_space<vmem>>, vector<1x1x1x1x4x4xf32>
    %18 = vector.shape_cast %17 : vector<1x1x1x1x4x4xf32> to vector<4x4xf32>
    %19 = vector.shape_cast %16 : vector<4x4xf32> to vector<1x1x1x1x4x4xf32>
    tpu.vector_store %arg5[%c0_17, %c0_18, %c0_19, %c2, %c0_20, %c0_21], %19 {strides = array<i32>} : memref<1x4x4x4x4x4xf32, #tpu.memory_space<vmem>>, vector<1x1x1x1x4x4xf32>,
    %20 = vector.extract_strided_slice %7 {offsets = [0, 12], sizes = [4, 4], strides = [1, 1]} : vector<4x64xf32> to vector<4x4xf32>
    %c0_22 = arith.constant 0 : index
    %c0_23 = arith.constant 0 : index
    %c0_24 = arith.constant 0 : index
    %c3 = arith.constant 3 : index
    %c0_25 = arith.constant 0 : index
    %c0_26 = arith.constant 0 : index
    %21 = vector.load %arg5[%c0_22, %c0_23, %c0_24, %c3, %c0_25, %c0_26] : memref<1x4x4x4x4x4xf32, #tpu.memory_space<vmem>>, vector<1x1x1x1x4x4xf32>
    %22 = vector.shape_cast %21 : vector<1x1x1x1x4x4xf32> to vector<4x4xf32>
    %23 = vector.shape_cast %20 : vector<4x4xf32> to vector<1x1x1x1x4x4xf32>
    tpu.vector_store %arg5[%c0_22, %c0_23, %c0_24, %c3, %c0_25, %c0_26], %23 {strides = array<i32>} : memref<1x4x4x4x4x4xf32, #tpu.memory_space<vmem>>, vector<1x1x1x1x4x4xf32>,
    %24 = vector.extract_strided_slice %7 {offsets = [0, 16], sizes = [4, 4], strides = [1, 1]} : vector<4x64xf32> to vector<4x4xf32>
    %c0_27 = arith.constant 0 : index
    %c1_28 = arith.constant 1 : index
    %c0_29 = arith.constant 0 : index
    %c0_30 = arith.constant 0 : index
    %c0_31 = arith.constant 0 : index
    %c0_32 = arith.constant 0 : index
    %25 = vector.load %arg5[%c0_27, %c1_28, %c0_29, %c0_30, %c0_31, %c0_32] : memref<1x4x4x4x4x4xf32, #tpu.memory_space<vmem>>, vector<1x1x1x1x4x4xf32>
    %26 = vector.shape_cast %25 : vector<1x1x1x1x4x4xf32> to vector<4x4xf32>
    %27 = vector.shape_cast %24 : vector<4x4xf32> to vector<1x1x1x1x4x4xf32>
    tpu.vector_store %arg5[%c0_27, %c1_28, %c0_29, %c0_30, %c0_31, %c0_32], %27 {strides = array<i32>} : memref<1x4x4x4x4x4xf32, #tpu.memory_space<vmem>>, vector<1x1x1x1x4x4xf32>,
    %28 = vector.extract_strided_slice %7 {offsets = [0, 20], sizes = [4, 4], strides = [1, 1]} : vector<4x64xf32> to vector<4x4xf32>
    %c0_33 = arith.constant 0 : index
    %c1_34 = arith.constant 1 : index
    %c0_35 = arith.constant 0 : index
    %c1_36 = arith.constant 1 : index
    %c0_37 = arith.constant 0 : index
    %c0_38 = arith.constant 0 : index
    %29 = vector.load %arg5[%c0_33, %c1_34, %c0_35, %c1_36, %c0_37, %c0_38] : memref<1x4x4x4x4x4xf32, #tpu.memory_space<vmem>>, vector<1x1x1x1x4x4xf32>
    %30 = vector.shape_cast %29 : vector<1x1x1x1x4x4xf32> to vector<4x4xf32>
    %31 = vector.shape_cast %28 : vector<4x4xf32> to vector<1x1x1x1x4x4xf32>
    tpu.vector_store %arg5[%c0_33, %c1_34, %c0_35, %c1_36, %c0_37, %c0_38], %31 {strides = array<i32>} : memref<1x4x4x4x4x4xf32, #tpu.memory_space<vmem>>, vector<1x1x1x1x4x4xf32>,
    %32 = vector.extract_strided_slice %7 {offsets = [0, 24], sizes = [4, 4], strides = [1, 1]} : vector<4x64xf32> to vector<4x4xf32>
    %c0_39 = arith.constant 0 : index
    %c1_40 = arith.constant 1 : index
    %c0_41 = arith.constant 0 : index
    %c2_42 = arith.constant 2 : index
    %c0_43 = arith.constant 0 : index
    %c0_44 = arith.constant 0 : index
    %33 = vector.load %arg5[%c0_39, %c1_40, %c0_41, %c2_42, %c0_43, %c0_44] : memref<1x4x4x4x4x4xf32, #tpu.memory_space<vmem>>, vector<1x1x1x1x4x4xf32>
    %34 = vector.shape_cast %33 : vector<1x1x1x1x4x4xf32> to vector<4x4xf32>
    %35 = vector.shape_cast %32 : vector<4x4xf32> to vector<1x1x1x1x4x4xf32>
    tpu.vector_store %arg5[%c0_39, %c1_40, %c0_41, %c2_42, %c0_43, %c0_44], %35 {strides = array<i32>} : memref<1x4x4x4x4x4xf32, #tpu.memory_space<vmem>>, vector<1x1x1x1x4x4xf32>,
    %36 = vector.extract_strided_slice %7 {offsets = [0, 28], sizes = [4, 4], strides = [1, 1]} : vector<4x64xf32> to vector<4x4xf32>
    %c0_45 = arith.constant 0 : index
    %c1_46 = arith.constant 1 : index
    %c0_47 = arith.constant 0 : index
    %c3_48 = arith.constant 3 : index
    %c0_49 = arith.constant 0 : index
    %c0_50 = arith.constant 0 : index
    %37 = vector.load %arg5[%c0_45, %c1_46, %c0_47, %c3_48, %c0_49, %c0_50] : memref<1x4x4x4x4x4xf32, #tpu.memory_space<vmem>>, vector<1x1x1x1x4x4xf32>
    %38 = vector.shape_cast %37 : vector<1x1x1x1x4x4xf32> to vector<4x4xf32>
    %39 = vector.shape_cast %36 : vector<4x4xf32> to vector<1x1x1x1x4x4xf32>
    tpu.vector_store %arg5[%c0_45, %c1_46, %c0_47, %c3_48, %c0_49, %c0_50], %39 {strides = array<i32>} : memref<1x4x4x4x4x4xf32, #tpu.memory_space<vmem>>, vector<1x1x1x1x4x4xf32>,
    %40 = vector.extract_strided_slice %7 {offsets = [0, 32], sizes = [4, 4], strides = [1, 1]} : vector<4x64xf32> to vector<4x4xf32>
    %c0_51 = arith.constant 0 : index
    %c2_52 = arith.constant 2 : index
    %c0_53 = arith.constant 0 : index
    %c0_54 = arith.constant 0 : index
    %c0_55 = arith.constant 0 : index
    %c0_56 = arith.constant 0 : index
    %41 = vector.load %arg5[%c0_51, %c2_52, %c0_53, %c0_54, %c0_55, %c0_56] : memref<1x4x4x4x4x4xf32, #tpu.memory_space<vmem>>, vector<1x1x1x1x4x4xf32>
    %42 = vector.shape_cast %41 : vector<1x1x1x1x4x4xf32> to vector<4x4xf32>
    %43 = vector.shape_cast %40 : vector<4x4xf32> to vector<1x1x1x1x4x4xf32>
    tpu.vector_store %arg5[%c0_51, %c2_52, %c0_53, %c0_54, %c0_55, %c0_56], %43 {strides = array<i32>} : memref<1x4x4x4x4x4xf32, #tpu.memory_space<vmem>>, vector<1x1x1x1x4x4xf32>,
    %44 = vector.extract_strided_slice %7 {offsets = [0, 36], sizes = [4, 4], strides = [1, 1]} : vector<4x64xf32> to vector<4x4xf32>
    %c0_57 = arith.constant 0 : index
    %c2_58 = arith.constant 2 : index
    %c0_59 = arith.constant 0 : index
    %c1_60 = arith.constant 1 : index
    %c0_61 = arith.constant 0 : index
    %c0_62 = arith.constant 0 : index
    %45 = vector.load %arg5[%c0_57, %c2_58, %c0_59, %c1_60, %c0_61, %c0_62] : memref<1x4x4x4x4x4xf32, #tpu.memory_space<vmem>>, vector<1x1x1x1x4x4xf32>
    %46 = vector.shape_cast %45 : vector<1x1x1x1x4x4xf32> to vector<4x4xf32>
    %47 = vector.shape_cast %44 : vector<4x4xf32> to vector<1x1x1x1x4x4xf32>
    tpu.vector_store %arg5[%c0_57, %c2_58, %c0_59, %c1_60, %c0_61, %c0_62], %47 {strides = array<i32>} : memref<1x4x4x4x4x4xf32, #tpu.memory_space<vmem>>, vector<1x1x1x1x4x4xf32>,
    %48 = vector.extract_strided_slice %7 {offsets = [0, 40], sizes = [4, 4], strides = [1, 1]} : vector<4x64xf32> to vector<4x4xf32>
    %c0_63 = arith.constant 0 : index
    %c2_64 = arith.constant 2 : index
    %c0_65 = arith.constant 0 : index
    %c2_66 = arith.constant 2 : index
    %c0_67 = arith.constant 0 : index
    %c0_68 = arith.constant 0 : index
    %49 = vector.load %arg5[%c0_63, %c2_64, %c0_65, %c2_66, %c0_67, %c0_68] : memref<1x4x4x4x4x4xf32, #tpu.memory_space<vmem>>, vector<1x1x1x1x4x4xf32>
    %50 = vector.shape_cast %49 : vector<1x1x1x1x4x4xf32> to vector<4x4xf32>
    %51 = vector.shape_cast %48 : vector<4x4xf32> to vector<1x1x1x1x4x4xf32>
    tpu.vector_store %arg5[%c0_63, %c2_64, %c0_65, %c2_66, %c0_67, %c0_68], %51 {strides = array<i32>} : memref<1x4x4x4x4x4xf32, #tpu.memory_space<vmem>>, vector<1x1x1x1x4x4xf32>,
    %52 = vector.extract_strided_slice %7 {offsets = [0, 44], sizes = [4, 4], strides = [1, 1]} : vector<4x64xf32> to vector<4x4xf32>
    %c0_69 = arith.constant 0 : index
    %c2_70 = arith.constant 2 : index
    %c0_71 = arith.constant 0 : index
    %c3_72 = arith.constant 3 : index
    %c0_73 = arith.constant 0 : index
    %c0_74 = arith.constant 0 : index
    %53 = vector.load %arg5[%c0_69, %c2_70, %c0_71, %c3_72, %c0_73, %c0_74] : memref<1x4x4x4x4x4xf32, #tpu.memory_space<vmem>>, vector<1x1x1x1x4x4xf32>
    %54 = vector.shape_cast %53 : vector<1x1x1x1x4x4xf32> to vector<4x4xf32>
    %55 = vector.shape_cast %52 : vector<4x4xf32> to vector<1x1x1x1x4x4xf32>
    tpu.vector_store %arg5[%c0_69, %c2_70, %c0_71, %c3_72, %c0_73, %c0_74], %55 {strides = array<i32>} : memref<1x4x4x4x4x4xf32, #tpu.memory_space<vmem>>, vector<1x1x1x1x4x4xf32>,
    %56 = vector.extract_strided_slice %7 {offsets = [0, 48], sizes = [4, 4], strides = [1, 1]} : vector<4x64xf32> to vector<4x4xf32>
    %c0_75 = arith.constant 0 : index
    %c3_76 = arith.constant 3 : index
    %c0_77 = arith.constant 0 : index
    %c0_78 = arith.constant 0 : index
    %c0_79 = arith.constant 0 : index
    %c0_80 = arith.constant 0 : index
    %57 = vector.load %arg5[%c0_75, %c3_76, %c0_77, %c0_78, %c0_79, %c0_80] : memref<1x4x4x4x4x4xf32, #tpu.memory_space<vmem>>, vector<1x1x1x1x4x4xf32>
    %58 = vector.shape_cast %57 : vector<1x1x1x1x4x4xf32> to vector<4x4xf32>
    %59 = vector.shape_cast %56 : vector<4x4xf32> to vector<1x1x1x1x4x4xf32>
    tpu.vector_store %arg5[%c0_75, %c3_76, %c0_77, %c0_78, %c0_79, %c0_80], %59 {strides = array<i32>} : memref<1x4x4x4x4x4xf32, #tpu.memory_space<vmem>>, vector<1x1x1x1x4x4xf32>,
    %60 = vector.extract_strided_slice %7 {offsets = [0, 52], sizes = [4, 4], strides = [1, 1]} : vector<4x64xf32> to vector<4x4xf32>
    %c0_81 = arith.constant 0 : index
    %c3_82 = arith.constant 3 : index
    %c0_83 = arith.constant 0 : index
    %c1_84 = arith.constant 1 : index
    %c0_85 = arith.constant 0 : index
    %c0_86 = arith.constant 0 : index
    %61 = vector.load %arg5[%c0_81, %c3_82, %c0_83, %c1_84, %c0_85, %c0_86] : memref<1x4x4x4x4x4xf32, #tpu.memory_space<vmem>>, vector<1x1x1x1x4x4xf32>
    %62 = vector.shape_cast %61 : vector<1x1x1x1x4x4xf32> to vector<4x4xf32>
    %63 = vector.shape_cast %60 : vector<4x4xf32> to vector<1x1x1x1x4x4xf32>
    tpu.vector_store %arg5[%c0_81, %c3_82, %c0_83, %c1_84, %c0_85, %c0_86], %63 {strides = array<i32>} : memref<1x4x4x4x4x4xf32, #tpu.memory_space<vmem>>, vector<1x1x1x1x4x4xf32>,
    %64 = vector.extract_strided_slice %7 {offsets = [0, 56], sizes = [4, 4], strides = [1, 1]} : vector<4x64xf32> to vector<4x4xf32>
    %c0_87 = arith.constant 0 : index
    %c3_88 = arith.constant 3 : index
    %c0_89 = arith.constant 0 : index
    %c2_90 = arith.constant 2 : index
    %c0_91 = arith.constant 0 : index
    %c0_92 = arith.constant 0 : index
    %65 = vector.load %arg5[%c0_87, %c3_88, %c0_89, %c2_90, %c0_91, %c0_92] : memref<1x4x4x4x4x4xf32, #tpu.memory_space<vmem>>, vector<1x1x1x1x4x4xf32>
    %66 = vector.shape_cast %65 : vector<1x1x1x1x4x4xf32> to vector<4x4xf32>
    %67 = vector.shape_cast %64 : vector<4x4xf32> to vector<1x1x1x1x4x4xf32>
    tpu.vector_store %arg5[%c0_87, %c3_88, %c0_89, %c2_90, %c0_91, %c0_92], %67 {strides = array<i32>} : memref<1x4x4x4x4x4xf32, #tpu.memory_space<vmem>>, vector<1x1x1x1x4x4xf32>,
    %68 = vector.extract_strided_slice %7 {offsets = [0, 60], sizes = [4, 4], strides = [1, 1]} : vector<4x64xf32> to vector<4x4xf32>
    %c0_93 = arith.constant 0 : index
    %c3_94 = arith.constant 3 : index
    %c0_95 = arith.constant 0 : index
    %c3_96 = arith.constant 3 : index
    %c0_97 = arith.constant 0 : index
    %c0_98 = arith.constant 0 : index
    %69 = vector.load %arg5[%c0_93, %c3_94, %c0_95, %c3_96, %c0_97, %c0_98] : memref<1x4x4x4x4x4xf32, #tpu.memory_space<vmem>>, vector<1x1x1x1x4x4xf32>
    %70 = vector.shape_cast %69 : vector<1x1x1x1x4x4xf32> to vector<4x4xf32>
    %71 = vector.shape_cast %68 : vector<4x4xf32> to vector<1x1x1x1x4x4xf32>
    tpu.vector_store %arg5[%c0_93, %c3_94, %c0_95, %c3_96, %c0_97, %c0_98], %71 {strides = array<i32>} : memref<1x4x4x4x4x4xf32, #tpu.memory_space<vmem>>, vector<1x1x1x1x4x4xf32>,
    %72 = vector.extract_strided_slice %6 {offsets = [4, 0], sizes = [4, 64], strides = [1, 1]} : vector<16x64xf32> to vector<4x64xf32>
    %73 = vector.extract_strided_slice %72 {offsets = [0, 0], sizes = [4, 4], strides = [1, 1]} : vector<4x64xf32> to vector<4x4xf32>
    %c0_99 = arith.constant 0 : index
    %c0_100 = arith.constant 0 : index
    %c1_101 = arith.constant 1 : index
    %c0_102 = arith.constant 0 : index
    %c0_103 = arith.constant 0 : index
    %c0_104 = arith.constant 0 : index
    %74 = vector.load %arg5[%c0_99, %c0_100, %c1_101, %c0_102, %c0_103, %c0_104] : memref<1x4x4x4x4x4xf32, #tpu.memory_space<vmem>>, vector<1x1x1x1x4x4xf32>
    %75 = vector.shape_cast %74 : vector<1x1x1x1x4x4xf32> to vector<4x4xf32>
    %76 = vector.shape_cast %73 : vector<4x4xf32> to vector<1x1x1x1x4x4xf32>
    tpu.vector_store %arg5[%c0_99, %c0_100, %c1_101, %c0_102, %c0_103, %c0_104], %76 {strides = array<i32>} : memref<1x4x4x4x4x4xf32, #tpu.memory_space<vmem>>, vector<1x1x1x1x4x4xf32>,
    %77 = vector.extract_strided_slice %72 {offsets = [0, 4], sizes = [4, 4], strides = [1, 1]} : vector<4x64xf32> to vector<4x4xf32>
    %c0_105 = arith.constant 0 : index
    %c0_106 = arith.constant 0 : index
    %c1_107 = arith.constant 1 : index
    %c1_108 = arith.constant 1 : index
    %c0_109 = arith.constant 0 : index
    %c0_110 = arith.constant 0 : index
    %78 = vector.load %arg5[%c0_105, %c0_106, %c1_107, %c1_108, %c0_109, %c0_110] : memref<1x4x4x4x4x4xf32, #tpu.memory_space<vmem>>, vector<1x1x1x1x4x4xf32>
    %79 = vector.shape_cast %78 : vector<1x1x1x1x4x4xf32> to vector<4x4xf32>
    %80 = vector.shape_cast %77 : vector<4x4xf32> to vector<1x1x1x1x4x4xf32>
    tpu.vector_store %arg5[%c0_105, %c0_106, %c1_107, %c1_108, %c0_109, %c0_110], %80 {strides = array<i32>} : memref<1x4x4x4x4x4xf32, #tpu.memory_space<vmem>>, vector<1x1x1x1x4x4xf32>,
    %81 = vector.extract_strided_slice %72 {offsets = [0, 8], sizes = [4, 4], strides = [1, 1]} : vector<4x64xf32> to vector<4x4xf32>
    %c0_111 = arith.constant 0 : index
    %c0_112 = arith.constant 0 : index
    %c1_113 = arith.constant 1 : index
    %c2_114 = arith.constant 2 : index
    %c0_115 = arith.constant 0 : index
    %c0_116 = arith.constant 0 : index
    %82 = vector.load %arg5[%c0_111, %c0_112, %c1_113, %c2_114, %c0_115, %c0_116] : memref<1x4x4x4x4x4xf32, #tpu.memory_space<vmem>>, vector<1x1x1x1x4x4xf32>
    %83 = vector.shape_cast %82 : vector<1x1x1x1x4x4xf32> to vector<4x4xf32>
    %84 = vector.shape_cast %81 : vector<4x4xf32> to vector<1x1x1x1x4x4xf32>
    tpu.vector_store %arg5[%c0_111, %c0_112, %c1_113, %c2_114, %c0_115, %c0_116], %84 {strides = array<i32>} : memref<1x4x4x4x4x4xf32, #tpu.memory_space<vmem>>, vector<1x1x1x1x4x4xf32>,
    %85 = vector.extract_strided_slice %72 {offsets = [0, 12], sizes = [4, 4], strides = [1, 1]} : vector<4x64xf32> to vector<4x4xf32>
    %c0_117 = arith.constant 0 : index
    %c0_118 = arith.constant 0 : index
    %c1_119 = arith.constant 1 : index
    %c3_120 = arith.constant 3 : index
    %c0_121 = arith.constant 0 : index
    %c0_122 = arith.constant 0 : index
    %86 = vector.load %arg5[%c0_117, %c0_118, %c1_119, %c3_120, %c0_121, %c0_122] : memref<1x4x4x4x4x4xf32, #tpu.memory_space<vmem>>, vector<1x1x1x1x4x4xf32>
    %87 = vector.shape_cast %86 : vector<1x1x1x1x4x4xf32> to vector<4x4xf32>
    %88 = vector.shape_cast %85 : vector<4x4xf32> to vector<1x1x1x1x4x4xf32>
    tpu.vector_store %arg5[%c0_117, %c0_118, %c1_119, %c3_120, %c0_121, %c0_122], %88 {strides = array<i32>} : memref<1x4x4x4x4x4xf32, #tpu.memory_space<vmem>>, vector<1x1x1x1x4x4xf32>,
    %89 = vector.extract_strided_slice %72 {offsets = [0, 16], sizes = [4, 4], strides = [1, 1]} : vector<4x64xf32> to vector<4x4xf32>
    %c0_123 = arith.constant 0 : index
    %c1_124 = arith.constant 1 : index
    %c1_125 = arith.constant 1 : index
    %c0_126 = arith.constant 0 : index
    %c0_127 = arith.constant 0 : index
    %c0_128 = arith.constant 0 : index
    %90 = vector.load %arg5[%c0_123, %c1_124, %c1_125, %c0_126, %c0_127, %c0_128] : memref<1x4x4x4x4x4xf32, #tpu.memory_space<vmem>>, vector<1x1x1x1x4x4xf32>
    %91 = vector.shape_cast %90 : vector<1x1x1x1x4x4xf32> to vector<4x4xf32>
    %92 = vector.shape_cast %89 : vector<4x4xf32> to vector<1x1x1x1x4x4xf32>
    tpu.vector_store %arg5[%c0_123, %c1_124, %c1_125, %c0_126, %c0_127, %c0_128], %92 {strides = array<i32>} : memref<1x4x4x4x4x4xf32, #tpu.memory_space<vmem>>, vector<1x1x1x1x4x4xf32>,
    %93 = vector.extract_strided_slice %72 {offsets = [0, 20], sizes = [4, 4], strides = [1, 1]} : vector<4x64xf32> to vector<4x4xf32>
    %c0_129 = arith.constant 0 : index
    %c1_130 = arith.constant 1 : index
    %c1_131 = arith.constant 1 : index
    %c1_132 = arith.constant 1 : index
    %c0_133 = arith.constant 0 : index
    %c0_134 = arith.constant 0 : index
    %94 = vector.load %arg5[%c0_129, %c1_130, %c1_131, %c1_132, %c0_133, %c0_134] : memref<1x4x4x4x4x4xf32, #tpu.memory_space<vmem>>, vector<1x1x1x1x4x4xf32>
    %95 = vector.shape_cast %94 : vector<1x1x1x1x4x4xf32> to vector<4x4xf32>
    %96 = vector.shape_cast %93 : vector<4x4xf32> to vector<1x1x1x1x4x4xf32>
    tpu.vector_store %arg5[%c0_129, %c1_130, %c1_131, %c1_132, %c0_133, %c0_134], %96 {strides = array<i32>} : memref<1x4x4x4x4x4xf32, #tpu.memory_space<vmem>>, vector<1x1x1x1x4x4xf32>,
    %97 = vector.extract_strided_slice %72 {offsets = [0, 24], sizes = [4, 4], strides = [1, 1]} : vector<4x64xf32> to vector<4x4xf32>
    %c0_135 = arith.constant 0 : index
    %c1_136 = arith.constant 1 : index
    %c1_137 = arith.constant 1 : index
    %c2_138 = arith.constant 2 : index
    %c0_139 = arith.constant 0 : index
    %c0_140 = arith.constant 0 : index
    %98 = vector.load %arg5[%c0_135, %c1_136, %c1_137, %c2_138, %c0_139, %c0_140] : memref<1x4x4x4x4x4xf32, #tpu.memory_space<vmem>>, vector<1x1x1x1x4x4xf32>
    %99 = vector.shape_cast %98 : vector<1x1x1x1x4x4xf32> to vector<4x4xf32>
    %100 = vector.shape_cast %97 : vector<4x4xf32> to vector<1x1x1x1x4x4xf32>
    tpu.vector_store %arg5[%c0_135, %c1_136, %c1_137, %c2_138, %c0_139, %c0_140], %100 {strides = array<i32>} : memref<1x4x4x4x4x4xf32, #tpu.memory_space<vmem>>, vector<1x1x1x1x4x4xf32>,
    %101 = vector.extract_strided_slice %72 {offsets = [0, 28], sizes = [4, 4], strides = [1, 1]} : vector<4x64xf32> to vector<4x4xf32>
    %c0_141 = arith.constant 0 : index
    %c1_142 = arith.constant 1 : index
    %c1_143 = arith.constant 1 : index
    %c3_144 = arith.constant 3 : index
    %c0_145 = arith.constant 0 : index
    %c0_146 = arith.constant 0 : index
    %102 = vector.load %arg5[%c0_141, %c1_142, %c1_143, %c3_144, %c0_145, %c0_146] : memref<1x4x4x4x4x4xf32, #tpu.memory_space<vmem>>, vector<1x1x1x1x4x4xf32>
    %103 = vector.shape_cast %102 : vector<1x1x1x1x4x4xf32> to vector<4x4xf32>
    %104 = vector.shape_cast %101 : vector<4x4xf32> to vector<1x1x1x1x4x4xf32>
    tpu.vector_store %arg5[%c0_141, %c1_142, %c1_143, %c3_144, %c0_145, %c0_146], %104 {strides = array<i32>} : memref<1x4x4x4x4x4xf32, #tpu.memory_space<vmem>>, vector<1x1x1x1x4x4xf32>,
    %105 = vector.extract_strided_slice %72 {offsets = [0, 32], sizes = [4, 4], strides = [1, 1]} : vector<4x64xf32> to vector<4x4xf32>
    %c0_147 = arith.constant 0 : index
    %c2_148 = arith.constant 2 : index
    %c1_149 = arith.constant 1 : index
    %c0_150 = arith.constant 0 : index
    %c0_151 = arith.constant 0 : index
    %c0_152 = arith.constant 0 : index
    %106 = vector.load %arg5[%c0_147, %c2_148, %c1_149, %c0_150, %c0_151, %c0_152] : memref<1x4x4x4x4x4xf32, #tpu.memory_space<vmem>>, vector<1x1x1x1x4x4xf32>
    %107 = vector.shape_cast %106 : vector<1x1x1x1x4x4xf32> to vector<4x4xf32>
    %108 = vector.shape_cast %105 : vector<4x4xf32> to vector<1x1x1x1x4x4xf32>
    tpu.vector_store %arg5[%c0_147, %c2_148, %c1_149, %c0_150, %c0_151, %c0_152], %108 {strides = array<i32>} : memref<1x4x4x4x4x4xf32, #tpu.memory_space<vmem>>, vector<1x1x1x1x4x4xf32>,
    %109 = vector.extract_strided_slice %72 {offsets = [0, 36], sizes = [4, 4], strides = [1, 1]} : vector<4x64xf32> to vector<4x4xf32>
    %c0_153 = arith.constant 0 : index
    %c2_154 = arith.constant 2 : index
    %c1_155 = arith.constant 1 : index
    %c1_156 = arith.constant 1 : index
    %c0_157 = arith.constant 0 : index
    %c0_158 = arith.constant 0 : index
    %110 = vector.load %arg5[%c0_153, %c2_154, %c1_155, %c1_156, %c0_157, %c0_158] : memref<1x4x4x4x4x4xf32, #tpu.memory_space<vmem>>, vector<1x1x1x1x4x4xf32>
    %111 = vector.shape_cast %110 : vector<1x1x1x1x4x4xf32> to vector<4x4xf32>
    %112 = vector.shape_cast %109 : vector<4x4xf32> to vector<1x1x1x1x4x4xf32>
    tpu.vector_store %arg5[%c0_153, %c2_154, %c1_155, %c1_156, %c0_157, %c0_158], %112 {strides = array<i32>} : memref<1x4x4x4x4x4xf32, #tpu.memory_space<vmem>>, vector<1x1x1x1x4x4xf32>,
    %113 = vector.extract_strided_slice %72 {offsets = [0, 40], sizes = [4, 4], strides = [1, 1]} : vector<4x64xf32> to vector<4x4xf32>
    %c0_159 = arith.constant 0 : index
    %c2_160 = arith.constant 2 : index
    %c1_161 = arith.constant 1 : index
    %c2_162 = arith.constant 2 : index
    %c0_163 = arith.constant 0 : index
    %c0_164 = arith.constant 0 : index
    %114 = vector.load %arg5[%c0_159, %c2_160, %c1_161, %c2_162, %c0_163, %c0_164] : memref<1x4x4x4x4x4xf32, #tpu.memory_space<vmem>>, vector<1x1x1x1x4x4xf32>
    %115 = vector.shape_cast %114 : vector<1x1x1x1x4x4xf32> to vector<4x4xf32>
    %116 = vector.shape_cast %113 : vector<4x4xf32> to vector<1x1x1x1x4x4xf32>
    tpu.vector_store %arg5[%c0_159, %c2_160, %c1_161, %c2_162, %c0_163, %c0_164], %116 {strides = array<i32>} : memref<1x4x4x4x4x4xf32, #tpu.memory_space<vmem>>, vector<1x1x1x1x4x4xf32>,
    %117 = vector.extract_strided_slice %72 {offsets = [0, 44], sizes = [4, 4], strides = [1, 1]} : vector<4x64xf32> to vector<4x4xf32>
    %c0_165 = arith.constant 0 : index
    %c2_166 = arith.constant 2 : index
    %c1_167 = arith.constant 1 : index
    %c3_168 = arith.constant 3 : index
    %c0_169 = arith.constant 0 : index
    %c0_170 = arith.constant 0 : index
    %118 = vector.load %arg5[%c0_165, %c2_166, %c1_167, %c3_168, %c0_169, %c0_170] : memref<1x4x4x4x4x4xf32, #tpu.memory_space<vmem>>, vector<1x1x1x1x4x4xf32>
    %119 = vector.shape_cast %118 : vector<1x1x1x1x4x4xf32> to vector<4x4xf32>
    %120 = vector.shape_cast %117 : vector<4x4xf32> to vector<1x1x1x1x4x4xf32>
    tpu.vector_store %arg5[%c0_165, %c2_166, %c1_167, %c3_168, %c0_169, %c0_170], %120 {strides = array<i32>} : memref<1x4x4x4x4x4xf32, #tpu.memory_space<vmem>>, vector<1x1x1x1x4x4xf32>,
    %121 = vector.extract_strided_slice %72 {offsets = [0, 48], sizes = [4, 4], strides = [1, 1]} : vector<4x64xf32> to vector<4x4xf32>
    %c0_171 = arith.constant 0 : index
    %c3_172 = arith.constant 3 : index
    %c1_173 = arith.constant 1 : index
    %c0_174 = arith.constant 0 : index
    %c0_175 = arith.constant 0 : index
    %c0_176 = arith.constant 0 : index
    %122 = vector.load %arg5[%c0_171, %c3_172, %c1_173, %c0_174, %c0_175, %c0_176] : memref<1x4x4x4x4x4xf32, #tpu.memory_space<vmem>>, vector<1x1x1x1x4x4xf32>
    %123 = vector.shape_cast %122 : vector<1x1x1x1x4x4xf32> to vector<4x4xf32>
    %124 = vector.shape_cast %121 : vector<4x4xf32> to vector<1x1x1x1x4x4xf32>
    tpu.vector_store %arg5[%c0_171, %c3_172, %c1_173, %c0_174, %c0_175, %c0_176], %124 {strides = array<i32>} : memref<1x4x4x4x4x4xf32, #tpu.memory_space<vmem>>, vector<1x1x1x1x4x4xf32>,
    %125 = vector.extract_strided_slice %72 {offsets = [0, 52], sizes = [4, 4], strides = [1, 1]} : vector<4x64xf32> to vector<4x4xf32>
    %c0_177 = arith.constant 0 : index
    %c3_178 = arith.constant 3 : index
    %c1_179 = arith.constant 1 : index
    %c1_180 = arith.constant 1 : index
    %c0_181 = arith.constant 0 : index
    %c0_182 = arith.constant 0 : index
    %126 = vector.load %arg5[%c0_177, %c3_178, %c1_179, %c1_180, %c0_181, %c0_182] : memref<1x4x4x4x4x4xf32, #tpu.memory_space<vmem>>, vector<1x1x1x1x4x4xf32>
    %127 = vector.shape_cast %126 : vector<1x1x1x1x4x4xf32> to vector<4x4xf32>
    %128 = vector.shape_cast %125 : vector<4x4xf32> to vector<1x1x1x1x4x4xf32>
    tpu.vector_store %arg5[%c0_177, %c3_178, %c1_179, %c1_180, %c0_181, %c0_182], %128 {strides = array<i32>} : memref<1x4x4x4x4x4xf32, #tpu.memory_space<vmem>>, vector<1x1x1x1x4x4xf32>,
    %129 = vector.extract_strided_slice %72 {offsets = [0, 56], sizes = [4, 4], strides = [1, 1]} : vector<4x64xf32> to vector<4x4xf32>
    %c0_183 = arith.constant 0 : index
    %c3_184 = arith.constant 3 : index
    %c1_185 = arith.constant 1 : index
    %c2_186 = arith.constant 2 : index
    %c0_187 = arith.constant 0 : index
    %c0_188 = arith.constant 0 : index
    %130 = vector.load %arg5[%c0_183, %c3_184, %c1_185, %c2_186, %c0_187, %c0_188] : memref<1x4x4x4x4x4xf32, #tpu.memory_space<vmem>>, vector<1x1x1x1x4x4xf32>
    %131 = vector.shape_cast %130 : vector<1x1x1x1x4x4xf32> to vector<4x4xf32>
    %132 = vector.shape_cast %129 : vector<4x4xf32> to vector<1x1x1x1x4x4xf32>
    tpu.vector_store %arg5[%c0_183, %c3_184, %c1_185, %c2_186, %c0_187, %c0_188], %132 {strides = array<i32>} : memref<1x4x4x4x4x4xf32, #tpu.memory_space<vmem>>, vector<1x1x1x1x4x4xf32>,
    %133 = vector.extract_strided_slice %72 {offsets = [0, 60], sizes = [4, 4], strides = [1, 1]} : vector<4x64xf32> to vector<4x4xf32>
    %c0_189 = arith.constant 0 : index
    %c3_190 = arith.constant 3 : index
    %c1_191 = arith.constant 1 : index
    %c3_192 = arith.constant 3 : index
    %c0_193 = arith.constant 0 : index
    %c0_194 = arith.constant 0 : index
    %134 = vector.load %arg5[%c0_189, %c3_190, %c1_191, %c3_192, %c0_193, %c0_194] : memref<1x4x4x4x4x4xf32, #tpu.memory_space<vmem>>, vector<1x1x1x1x4x4xf32>
    %135 = vector.shape_cast %134 : vector<1x1x1x1x4x4xf32> to vector<4x4xf32>
    %136 = vector.shape_cast %133 : vector<4x4xf32> to vector<1x1x1x1x4x4xf32>
    tpu.vector_store %arg5[%c0_189, %c3_190, %c1_191, %c3_192, %c0_193, %c0_194], %136 {strides = array<i32>} : memref<1x4x4x4x4x4xf32, #tpu.memory_space<vmem>>, vector<1x1x1x1x4x4xf32>,
    %137 = vector.extract_strided_slice %6 {offsets = [8, 0], sizes = [4, 64], strides = [1, 1]} : vector<16x64xf32> to vector<4x64xf32>
    %138 = vector.extract_strided_slice %137 {offsets = [0, 0], sizes = [4, 4], strides = [1, 1]} : vector<4x64xf32> to vector<4x4xf32>
    %c0_195 = arith.constant 0 : index
    %c0_196 = arith.constant 0 : index
    %c2_197 = arith.constant 2 : index
    %c0_198 = arith.constant 0 : index
    %c0_199 = arith.constant 0 : index
    %c0_200 = arith.constant 0 : index
    %139 = vector.load %arg5[%c0_195, %c0_196, %c2_197, %c0_198, %c0_199, %c0_200] : memref<1x4x4x4x4x4xf32, #tpu.memory_space<vmem>>, vector<1x1x1x1x4x4xf32>
    %140 = vector.shape_cast %139 : vector<1x1x1x1x4x4xf32> to vector<4x4xf32>
    %141 = vector.shape_cast %138 : vector<4x4xf32> to vector<1x1x1x1x4x4xf32>
    tpu.vector_store %arg5[%c0_195, %c0_196, %c2_197, %c0_198, %c0_199, %c0_200], %141 {strides = array<i32>} : memref<1x4x4x4x4x4xf32, #tpu.memory_space<vmem>>, vector<1x1x1x1x4x4xf32>,
    %142 = vector.extract_strided_slice %137 {offsets = [0, 4], sizes = [4, 4], strides = [1, 1]} : vector<4x64xf32> to vector<4x4xf32>
    %c0_201 = arith.constant 0 : index
    %c0_202 = arith.constant 0 : index
    %c2_203 = arith.constant 2 : index
    %c1_204 = arith.constant 1 : index
    %c0_205 = arith.constant 0 : index
    %c0_206 = arith.constant 0 : index
    %143 = vector.load %arg5[%c0_201, %c0_202, %c2_203, %c1_204, %c0_205, %c0_206] : memref<1x4x4x4x4x4xf32, #tpu.memory_space<vmem>>, vector<1x1x1x1x4x4xf32>
    %144 = vector.shape_cast %143 : vector<1x1x1x1x4x4xf32> to vector<4x4xf32>
    %145 = vector.shape_cast %142 : vector<4x4xf32> to vector<1x1x1x1x4x4xf32>
    tpu.vector_store %arg5[%c0_201, %c0_202, %c2_203, %c1_204, %c0_205, %c0_206], %145 {strides = array<i32>} : memref<1x4x4x4x4x4xf32, #tpu.memory_space<vmem>>, vector<1x1x1x1x4x4xf32>,
    %146 = vector.extract_strided_slice %137 {offsets = [0, 8], sizes = [4, 4], strides = [1, 1]} : vector<4x64xf32> to vector<4x4xf32>
    %c0_207 = arith.constant 0 : index
    %c0_208 = arith.constant 0 : index
    %c2_209 = arith.constant 2 : index
    %c2_210 = arith.constant 2 : index
    %c0_211 = arith.constant 0 : index
    %c0_212 = arith.constant 0 : index
    %147 = vector.load %arg5[%c0_207, %c0_208, %c2_209, %c2_210, %c0_211, %c0_212] : memref<1x4x4x4x4x4xf32, #tpu.memory_space<vmem>>, vector<1x1x1x1x4x4xf32>
    %148 = vector.shape_cast %147 : vector<1x1x1x1x4x4xf32> to vector<4x4xf32>
    %149 = vector.shape_cast %146 : vector<4x4xf32> to vector<1x1x1x1x4x4xf32>
    tpu.vector_store %arg5[%c0_207, %c0_208, %c2_209, %c2_210, %c0_211, %c0_212], %149 {strides = array<i32>} : memref<1x4x4x4x4x4xf32, #tpu.memory_space<vmem>>, vector<1x1x1x1x4x4xf32>,
    %150 = vector.extract_strided_slice %137 {offsets = [0, 12], sizes = [4, 4], strides = [1, 1]} : vector<4x64xf32> to vector<4x4xf32>
    %c0_213 = arith.constant 0 : index
    %c0_214 = arith.constant 0 : index
    %c2_215 = arith.constant 2 : index
    %c3_216 = arith.constant 3 : index
    %c0_217 = arith.constant 0 : index
    %c0_218 = arith.constant 0 : index
    %151 = vector.load %arg5[%c0_213, %c0_214, %c2_215, %c3_216, %c0_217, %c0_218] : memref<1x4x4x4x4x4xf32, #tpu.memory_space<vmem>>, vector<1x1x1x1x4x4xf32>
    %152 = vector.shape_cast %151 : vector<1x1x1x1x4x4xf32> to vector<4x4xf32>
    %153 = vector.shape_cast %150 : vector<4x4xf32> to vector<1x1x1x1x4x4xf32>
    tpu.vector_store %arg5[%c0_213, %c0_214, %c2_215, %c3_216, %c0_217, %c0_218], %153 {strides = array<i32>} : memref<1x4x4x4x4x4xf32, #tpu.memory_space<vmem>>, vector<1x1x1x1x4x4xf32>,
    %154 = vector.extract_strided_slice %137 {offsets = [0, 16], sizes = [4, 4], strides = [1, 1]} : vector<4x64xf32> to vector<4x4xf32>
    %c0_219 = arith.constant 0 : index
    %c1_220 = arith.constant 1 : index
    %c2_221 = arith.constant 2 : index
    %c0_222 = arith.constant 0 : index
    %c0_223 = arith.constant 0 : index
    %c0_224 = arith.constant 0 : index
    %155 = vector.load %arg5[%c0_219, %c1_220, %c2_221, %c0_222, %c0_223, %c0_224] : memref<1x4x4x4x4x4xf32, #tpu.memory_space<vmem>>, vector<1x1x1x1x4x4xf32>
    %156 = vector.shape_cast %155 : vector<1x1x1x1x4x4xf32> to vector<4x4xf32>
    %157 = vector.shape_cast %154 : vector<4x4xf32> to vector<1x1x1x1x4x4xf32>
    tpu.vector_store %arg5[%c0_219, %c1_220, %c2_221, %c0_222, %c0_223, %c0_224], %157 {strides = array<i32>} : memref<1x4x4x4x4x4xf32, #tpu.memory_space<vmem>>, vector<1x1x1x1x4x4xf32>,
    %158 = vector.extract_strided_slice %137 {offsets = [0, 20], sizes = [4, 4], strides = [1, 1]} : vector<4x64xf32> to vector<4x4xf32>
    %c0_225 = arith.constant 0 : index
    %c1_226 = arith.constant 1 : index
    %c2_227 = arith.constant 2 : index
    %c1_228 = arith.constant 1 : index
    %c0_229 = arith.constant 0 : index
    %c0_230 = arith.constant 0 : index
    %159 = vector.load %arg5[%c0_225, %c1_226, %c2_227, %c1_228, %c0_229, %c0_230] : memref<1x4x4x4x4x4xf32, #tpu.memory_space<vmem>>, vector<1x1x1x1x4x4xf32>
    %160 = vector.shape_cast %159 : vector<1x1x1x1x4x4xf32> to vector<4x4xf32>
    %161 = vector.shape_cast %158 : vector<4x4xf32> to vector<1x1x1x1x4x4xf32>
    tpu.vector_store %arg5[%c0_225, %c1_226, %c2_227, %c1_228, %c0_229, %c0_230], %161 {strides = array<i32>} : memref<1x4x4x4x4x4xf32, #tpu.memory_space<vmem>>, vector<1x1x1x1x4x4xf32>,
    %162 = vector.extract_strided_slice %137 {offsets = [0, 24], sizes = [4, 4], strides = [1, 1]} : vector<4x64xf32> to vector<4x4xf32>
    %c0_231 = arith.constant 0 : index
    %c1_232 = arith.constant 1 : index
    %c2_233 = arith.constant 2 : index
    %c2_234 = arith.constant 2 : index
    %c0_235 = arith.constant 0 : index
    %c0_236 = arith.constant 0 : index
    %163 = vector.load %arg5[%c0_231, %c1_232, %c2_233, %c2_234, %c0_235, %c0_236] : memref<1x4x4x4x4x4xf32, #tpu.memory_space<vmem>>, vector<1x1x1x1x4x4xf32>
    %164 = vector.shape_cast %163 : vector<1x1x1x1x4x4xf32> to vector<4x4xf32>
    %165 = vector.shape_cast %162 : vector<4x4xf32> to vector<1x1x1x1x4x4xf32>
    tpu.vector_store %arg5[%c0_231, %c1_232, %c2_233, %c2_234, %c0_235, %c0_236], %165 {strides = array<i32>} : memref<1x4x4x4x4x4xf32, #tpu.memory_space<vmem>>, vector<1x1x1x1x4x4xf32>,
    %166 = vector.extract_strided_slice %137 {offsets = [0, 28], sizes = [4, 4], strides = [1, 1]} : vector<4x64xf32> to vector<4x4xf32>
    %c0_237 = arith.constant 0 : index
    %c1_238 = arith.constant 1 : index
    %c2_239 = arith.constant 2 : index
    %c3_240 = arith.constant 3 : index
    %c0_241 = arith.constant 0 : index
    %c0_242 = arith.constant 0 : index
    %167 = vector.load %arg5[%c0_237, %c1_238, %c2_239, %c3_240, %c0_241, %c0_242] : memref<1x4x4x4x4x4xf32, #tpu.memory_space<vmem>>, vector<1x1x1x1x4x4xf32>
    %168 = vector.shape_cast %167 : vector<1x1x1x1x4x4xf32> to vector<4x4xf32>
    %169 = vector.shape_cast %166 : vector<4x4xf32> to vector<1x1x1x1x4x4xf32>
    tpu.vector_store %arg5[%c0_237, %c1_238, %c2_239, %c3_240, %c0_241, %c0_242], %169 {strides = array<i32>} : memref<1x4x4x4x4x4xf32, #tpu.memory_space<vmem>>, vector<1x1x1x1x4x4xf32>,
    %170 = vector.extract_strided_slice %137 {offsets = [0, 32], sizes = [4, 4], strides = [1, 1]} : vector<4x64xf32> to vector<4x4xf32>
    %c0_243 = arith.constant 0 : index
    %c2_244 = arith.constant 2 : index
    %c2_245 = arith.constant 2 : index
    %c0_246 = arith.constant 0 : index
    %c0_247 = arith.constant 0 : index
    %c0_248 = arith.constant 0 : index
    %171 = vector.load %arg5[%c0_243, %c2_244, %c2_245, %c0_246, %c0_247, %c0_248] : memref<1x4x4x4x4x4xf32, #tpu.memory_space<vmem>>, vector<1x1x1x1x4x4xf32>
    %172 = vector.shape_cast %171 : vector<1x1x1x1x4x4xf32> to vector<4x4xf32>
    %173 = vector.shape_cast %170 : vector<4x4xf32> to vector<1x1x1x1x4x4xf32>
    tpu.vector_store %arg5[%c0_243, %c2_244, %c2_245, %c0_246, %c0_247, %c0_248], %173 {strides = array<i32>} : memref<1x4x4x4x4x4xf32, #tpu.memory_space<vmem>>, vector<1x1x1x1x4x4xf32>,
    %174 = vector.extract_strided_slice %137 {offsets = [0, 36], sizes = [4, 4], strides = [1, 1]} : vector<4x64xf32> to vector<4x4xf32>
    %c0_249 = arith.constant 0 : index
    %c2_250 = arith.constant 2 : index
    %c2_251 = arith.constant 2 : index
    %c1_252 = arith.constant 1 : index
    %c0_253 = arith.constant 0 : index
    %c0_254 = arith.constant 0 : index
    %175 = vector.load %arg5[%c0_249, %c2_250, %c2_251, %c1_252, %c0_253, %c0_254] : memref<1x4x4x4x4x4xf32, #tpu.memory_space<vmem>>, vector<1x1x1x1x4x4xf32>
    %176 = vector.shape_cast %175 : vector<1x1x1x1x4x4xf32> to vector<4x4xf32>
    %177 = vector.shape_cast %174 : vector<4x4xf32> to vector<1x1x1x1x4x4xf32>
    tpu.vector_store %arg5[%c0_249, %c2_250, %c2_251, %c1_252, %c0_253, %c0_254], %177 {strides = array<i32>} : memref<1x4x4x4x4x4xf32, #tpu.memory_space<vmem>>, vector<1x1x1x1x4x4xf32>,
    %178 = vector.extract_strided_slice %137 {offsets = [0, 40], sizes = [4, 4], strides = [1, 1]} : vector<4x64xf32> to vector<4x4xf32>
    %c0_255 = arith.constant 0 : index
    %c2_256 = arith.constant 2 : index
    %c2_257 = arith.constant 2 : index
    %c2_258 = arith.constant 2 : index
    %c0_259 = arith.constant 0 : index
    %c0_260 = arith.constant 0 : index
    %179 = vector.load %arg5[%c0_255, %c2_256, %c2_257, %c2_258, %c0_259, %c0_260] : memref<1x4x4x4x4x4xf32, #tpu.memory_space<vmem>>, vector<1x1x1x1x4x4xf32>
    %180 = vector.shape_cast %179 : vector<1x1x1x1x4x4xf32> to vector<4x4xf32>
    %181 = vector.shape_cast %178 : vector<4x4xf32> to vector<1x1x1x1x4x4xf32>
    tpu.vector_store %arg5[%c0_255, %c2_256, %c2_257, %c2_258, %c0_259, %c0_260], %181 {strides = array<i32>} : memref<1x4x4x4x4x4xf32, #tpu.memory_space<vmem>>, vector<1x1x1x1x4x4xf32>,
    %182 = vector.extract_strided_slice %137 {offsets = [0, 44], sizes = [4, 4], strides = [1, 1]} : vector<4x64xf32> to vector<4x4xf32>
    %c0_261 = arith.constant 0 : index
    %c2_262 = arith.constant 2 : index
    %c2_263 = arith.constant 2 : index
    %c3_264 = arith.constant 3 : index
    %c0_265 = arith.constant 0 : index
    %c0_266 = arith.constant 0 : index
    %183 = vector.load %arg5[%c0_261, %c2_262, %c2_263, %c3_264, %c0_265, %c0_266] : memref<1x4x4x4x4x4xf32, #tpu.memory_space<vmem>>, vector<1x1x1x1x4x4xf32>
    %184 = vector.shape_cast %183 : vector<1x1x1x1x4x4xf32> to vector<4x4xf32>
    %185 = vector.shape_cast %182 : vector<4x4xf32> to vector<1x1x1x1x4x4xf32>
    tpu.vector_store %arg5[%c0_261, %c2_262, %c2_263, %c3_264, %c0_265, %c0_266], %185 {strides = array<i32>} : memref<1x4x4x4x4x4xf32, #tpu.memory_space<vmem>>, vector<1x1x1x1x4x4xf32>,
    %186 = vector.extract_strided_slice %137 {offsets = [0, 48], sizes = [4, 4], strides = [1, 1]} : vector<4x64xf32> to vector<4x4xf32>
    %c0_267 = arith.constant 0 : index
    %c3_268 = arith.constant 3 : index
    %c2_269 = arith.constant 2 : index
    %c0_270 = arith.constant 0 : index
    %c0_271 = arith.constant 0 : index
    %c0_272 = arith.constant 0 : index
    %187 = vector.load %arg5[%c0_267, %c3_268, %c2_269, %c0_270, %c0_271, %c0_272] : memref<1x4x4x4x4x4xf32, #tpu.memory_space<vmem>>, vector<1x1x1x1x4x4xf32>
    %188 = vector.shape_cast %187 : vector<1x1x1x1x4x4xf32> to vector<4x4xf32>
    %189 = vector.shape_cast %186 : vector<4x4xf32> to vector<1x1x1x1x4x4xf32>
    tpu.vector_store %arg5[%c0_267, %c3_268, %c2_269, %c0_270, %c0_271, %c0_272], %189 {strides = array<i32>} : memref<1x4x4x4x4x4xf32, #tpu.memory_space<vmem>>, vector<1x1x1x1x4x4xf32>,
    %190 = vector.extract_strided_slice %137 {offsets = [0, 52], sizes = [4, 4], strides = [1, 1]} : vector<4x64xf32> to vector<4x4xf32>
    %c0_273 = arith.constant 0 : index
    %c3_274 = arith.constant 3 : index
    %c2_275 = arith.constant 2 : index
    %c1_276 = arith.constant 1 : index
    %c0_277 = arith.constant 0 : index
    %c0_278 = arith.constant 0 : index
    %191 = vector.load %arg5[%c0_273, %c3_274, %c2_275, %c1_276, %c0_277, %c0_278] : memref<1x4x4x4x4x4xf32, #tpu.memory_space<vmem>>, vector<1x1x1x1x4x4xf32>
    %192 = vector.shape_cast %191 : vector<1x1x1x1x4x4xf32> to vector<4x4xf32>
    %193 = vector.shape_cast %190 : vector<4x4xf32> to vector<1x1x1x1x4x4xf32>
    tpu.vector_store %arg5[%c0_273, %c3_274, %c2_275, %c1_276, %c0_277, %c0_278], %193 {strides = array<i32>} : memref<1x4x4x4x4x4xf32, #tpu.memory_space<vmem>>, vector<1x1x1x1x4x4xf32>,
    %194 = vector.extract_strided_slice %137 {offsets = [0, 56], sizes = [4, 4], strides = [1, 1]} : vector<4x64xf32> to vector<4x4xf32>
    %c0_279 = arith.constant 0 : index
    %c3_280 = arith.constant 3 : index
    %c2_281 = arith.constant 2 : index
    %c2_282 = arith.constant 2 : index
    %c0_283 = arith.constant 0 : index
    %c0_284 = arith.constant 0 : index
    %195 = vector.load %arg5[%c0_279, %c3_280, %c2_281, %c2_282, %c0_283, %c0_284] : memref<1x4x4x4x4x4xf32, #tpu.memory_space<vmem>>, vector<1x1x1x1x4x4xf32>
    %196 = vector.shape_cast %195 : vector<1x1x1x1x4x4xf32> to vector<4x4xf32>
    %197 = vector.shape_cast %194 : vector<4x4xf32> to vector<1x1x1x1x4x4xf32>
    tpu.vector_store %arg5[%c0_279, %c3_280, %c2_281, %c2_282, %c0_283, %c0_284], %197 {strides = array<i32>} : memref<1x4x4x4x4x4xf32, #tpu.memory_space<vmem>>, vector<1x1x1x1x4x4xf32>,
    %198 = vector.extract_strided_slice %137 {offsets = [0, 60], sizes = [4, 4], strides = [1, 1]} : vector<4x64xf32> to vector<4x4xf32>
    %c0_285 = arith.constant 0 : index
    %c3_286 = arith.constant 3 : index
    %c2_287 = arith.constant 2 : index
    %c3_288 = arith.constant 3 : index
    %c0_289 = arith.constant 0 : index
    %c0_290 = arith.constant 0 : index
    %199 = vector.load %arg5[%c0_285, %c3_286, %c2_287, %c3_288, %c0_289, %c0_290] : memref<1x4x4x4x4x4xf32, #tpu.memory_space<vmem>>, vector<1x1x1x1x4x4xf32>
    %200 = vector.shape_cast %199 : vector<1x1x1x1x4x4xf32> to vector<4x4xf32>
    %201 = vector.shape_cast %198 : vector<4x4xf32> to vector<1x1x1x1x4x4xf32>
    tpu.vector_store %arg5[%c0_285, %c3_286, %c2_287, %c3_288, %c0_289, %c0_290], %201 {strides = array<i32>} : memref<1x4x4x4x4x4xf32, #tpu.memory_space<vmem>>, vector<1x1x1x1x4x4xf32>,
    %202 = vector.extract_strided_slice %6 {offsets = [12, 0], sizes = [4, 64], strides = [1, 1]} : vector<16x64xf32> to vector<4x64xf32>
    %203 = vector.extract_strided_slice %202 {offsets = [0, 0], sizes = [4, 4], strides = [1, 1]} : vector<4x64xf32> to vector<4x4xf32>
    %c0_291 = arith.constant 0 : index
    %c0_292 = arith.constant 0 : index
    %c3_293 = arith.constant 3 : index
    %c0_294 = arith.constant 0 : index
    %c0_295 = arith.constant 0 : index
    %c0_296 = arith.constant 0 : index
    %204 = vector.load %arg5[%c0_291, %c0_292, %c3_293, %c0_294, %c0_295, %c0_296] : memref<1x4x4x4x4x4xf32, #tpu.memory_space<vmem>>, vector<1x1x1x1x4x4xf32>
    %205 = vector.shape_cast %204 : vector<1x1x1x1x4x4xf32> to vector<4x4xf32>
    %206 = vector.shape_cast %203 : vector<4x4xf32> to vector<1x1x1x1x4x4xf32>
    tpu.vector_store %arg5[%c0_291, %c0_292, %c3_293, %c0_294, %c0_295, %c0_296], %206 {strides = array<i32>} : memref<1x4x4x4x4x4xf32, #tpu.memory_space<vmem>>, vector<1x1x1x1x4x4xf32>,
    %207 = vector.extract_strided_slice %202 {offsets = [0, 4], sizes = [4, 4], strides = [1, 1]} : vector<4x64xf32> to vector<4x4xf32>
    %c0_297 = arith.constant 0 : index
    %c0_298 = arith.constant 0 : index
    %c3_299 = arith.constant 3 : index
    %c1_300 = arith.constant 1 : index
    %c0_301 = arith.constant 0 : index
    %c0_302 = arith.constant 0 : index
    %208 = vector.load %arg5[%c0_297, %c0_298, %c3_299, %c1_300, %c0_301, %c0_302] : memref<1x4x4x4x4x4xf32, #tpu.memory_space<vmem>>, vector<1x1x1x1x4x4xf32>
    %209 = vector.shape_cast %208 : vector<1x1x1x1x4x4xf32> to vector<4x4xf32>
    %210 = vector.shape_cast %207 : vector<4x4xf32> to vector<1x1x1x1x4x4xf32>
    tpu.vector_store %arg5[%c0_297, %c0_298, %c3_299, %c1_300, %c0_301, %c0_302], %210 {strides = array<i32>} : memref<1x4x4x4x4x4xf32, #tpu.memory_space<vmem>>, vector<1x1x1x1x4x4xf32>,
    %211 = vector.extract_strided_slice %202 {offsets = [0, 8], sizes = [4, 4], strides = [1, 1]} : vector<4x64xf32> to vector<4x4xf32>
    %c0_303 = arith.constant 0 : index
    %c0_304 = arith.constant 0 : index
    %c3_305 = arith.constant 3 : index
    %c2_306 = arith.constant 2 : index
    %c0_307 = arith.constant 0 : index
    %c0_308 = arith.constant 0 : index
    %212 = vector.load %arg5[%c0_303, %c0_304, %c3_305, %c2_306, %c0_307, %c0_308] : memref<1x4x4x4x4x4xf32, #tpu.memory_space<vmem>>, vector<1x1x1x1x4x4xf32>
    %213 = vector.shape_cast %212 : vector<1x1x1x1x4x4xf32> to vector<4x4xf32>
    %214 = vector.shape_cast %211 : vector<4x4xf32> to vector<1x1x1x1x4x4xf32>
    tpu.vector_store %arg5[%c0_303, %c0_304, %c3_305, %c2_306, %c0_307, %c0_308], %214 {strides = array<i32>} : memref<1x4x4x4x4x4xf32, #tpu.memory_space<vmem>>, vector<1x1x1x1x4x4xf32>,
    %215 = vector.extract_strided_slice %202 {offsets = [0, 12], sizes = [4, 4], strides = [1, 1]} : vector<4x64xf32> to vector<4x4xf32>
    %c0_309 = arith.constant 0 : index
    %c0_310 = arith.constant 0 : index
    %c3_311 = arith.constant 3 : index
    %c3_312 = arith.constant 3 : index
    %c0_313 = arith.constant 0 : index
    %c0_314 = arith.constant 0 : index
    %216 = vector.load %arg5[%c0_309, %c0_310, %c3_311, %c3_312, %c0_313, %c0_314] : memref<1x4x4x4x4x4xf32, #tpu.memory_space<vmem>>, vector<1x1x1x1x4x4xf32>
    %217 = vector.shape_cast %216 : vector<1x1x1x1x4x4xf32> to vector<4x4xf32>
    %218 = vector.shape_cast %215 : vector<4x4xf32> to vector<1x1x1x1x4x4xf32>
    tpu.vector_store %arg5[%c0_309, %c0_310, %c3_311, %c3_312, %c0_313, %c0_314], %218 {strides = array<i32>} : memref<1x4x4x4x4x4xf32, #tpu.memory_space<vmem>>, vector<1x1x1x1x4x4xf32>,
    %219 = vector.extract_strided_slice %202 {offsets = [0, 16], sizes = [4, 4], strides = [1, 1]} : vector<4x64xf32> to vector<4x4xf32>
    %c0_315 = arith.constant 0 : index
    %c1_316 = arith.constant 1 : index
    %c3_317 = arith.constant 3 : index
    %c0_318 = arith.constant 0 : index
    %c0_319 = arith.constant 0 : index
    %c0_320 = arith.constant 0 : index
    %220 = vector.load %arg5[%c0_315, %c1_316, %c3_317, %c0_318, %c0_319, %c0_320] : memref<1x4x4x4x4x4xf32, #tpu.memory_space<vmem>>, vector<1x1x1x1x4x4xf32>
    %221 = vector.shape_cast %220 : vector<1x1x1x1x4x4xf32> to vector<4x4xf32>
    %222 = vector.shape_cast %219 : vector<4x4xf32> to vector<1x1x1x1x4x4xf32>
    tpu.vector_store %arg5[%c0_315, %c1_316, %c3_317, %c0_318, %c0_319, %c0_320], %222 {strides = array<i32>} : memref<1x4x4x4x4x4xf32, #tpu.memory_space<vmem>>, vector<1x1x1x1x4x4xf32>,
    %223 = vector.extract_strided_slice %202 {offsets = [0, 20], sizes = [4, 4], strides = [1, 1]} : vector<4x64xf32> to vector<4x4xf32>
    %c0_321 = arith.constant 0 : index
    %c1_322 = arith.constant 1 : index
    %c3_323 = arith.constant 3 : index
    %c1_324 = arith.constant 1 : index
    %c0_325 = arith.constant 0 : index
    %c0_326 = arith.constant 0 : index
    %224 = vector.load %arg5[%c0_321, %c1_322, %c3_323, %c1_324, %c0_325, %c0_326] : memref<1x4x4x4x4x4xf32, #tpu.memory_space<vmem>>, vector<1x1x1x1x4x4xf32>
    %225 = vector.shape_cast %224 : vector<1x1x1x1x4x4xf32> to vector<4x4xf32>
    %226 = vector.shape_cast %223 : vector<4x4xf32> to vector<1x1x1x1x4x4xf32>
    tpu.vector_store %arg5[%c0_321, %c1_322, %c3_323, %c1_324, %c0_325, %c0_326], %226 {strides = array<i32>} : memref<1x4x4x4x4x4xf32, #tpu.memory_space<vmem>>, vector<1x1x1x1x4x4xf32>,
    %227 = vector.extract_strided_slice %202 {offsets = [0, 24], sizes = [4, 4], strides = [1, 1]} : vector<4x64xf32> to vector<4x4xf32>
    %c0_327 = arith.constant 0 : index
    %c1_328 = arith.constant 1 : index
    %c3_329 = arith.constant 3 : index
    %c2_330 = arith.constant 2 : index
    %c0_331 = arith.constant 0 : index
    %c0_332 = arith.constant 0 : index
    %228 = vector.load %arg5[%c0_327, %c1_328, %c3_329, %c2_330, %c0_331, %c0_332] : memref<1x4x4x4x4x4xf32, #tpu.memory_space<vmem>>, vector<1x1x1x1x4x4xf32>
    %229 = vector.shape_cast %228 : vector<1x1x1x1x4x4xf32> to vector<4x4xf32>
    %230 = vector.shape_cast %227 : vector<4x4xf32> to vector<1x1x1x1x4x4xf32>
    tpu.vector_store %arg5[%c0_327, %c1_328, %c3_329, %c2_330, %c0_331, %c0_332], %230 {strides = array<i32>} : memref<1x4x4x4x4x4xf32, #tpu.memory_space<vmem>>, vector<1x1x1x1x4x4xf32>,
    %231 = vector.extract_strided_slice %202 {offsets = [0, 28], sizes = [4, 4], strides = [1, 1]} : vector<4x64xf32> to vector<4x4xf32>
    %c0_333 = arith.constant 0 : index
    %c1_334 = arith.constant 1 : index
    %c3_335 = arith.constant 3 : index
    %c3_336 = arith.constant 3 : index
    %c0_337 = arith.constant 0 : index
    %c0_338 = arith.constant 0 : index
    %232 = vector.load %arg5[%c0_333, %c1_334, %c3_335, %c3_336, %c0_337, %c0_338] : memref<1x4x4x4x4x4xf32, #tpu.memory_space<vmem>>, vector<1x1x1x1x4x4xf32>
    %233 = vector.shape_cast %232 : vector<1x1x1x1x4x4xf32> to vector<4x4xf32>
    %234 = vector.shape_cast %231 : vector<4x4xf32> to vector<1x1x1x1x4x4xf32>
    tpu.vector_store %arg5[%c0_333, %c1_334, %c3_335, %c3_336, %c0_337, %c0_338], %234 {strides = array<i32>} : memref<1x4x4x4x4x4xf32, #tpu.memory_space<vmem>>, vector<1x1x1x1x4x4xf32>,
    %235 = vector.extract_strided_slice %202 {offsets = [0, 32], sizes = [4, 4], strides = [1, 1]} : vector<4x64xf32> to vector<4x4xf32>
    %c0_339 = arith.constant 0 : index
    %c2_340 = arith.constant 2 : index
    %c3_341 = arith.constant 3 : index
    %c0_342 = arith.constant 0 : index
    %c0_343 = arith.constant 0 : index
    %c0_344 = arith.constant 0 : index
    %236 = vector.load %arg5[%c0_339, %c2_340, %c3_341, %c0_342, %c0_343, %c0_344] : memref<1x4x4x4x4x4xf32, #tpu.memory_space<vmem>>, vector<1x1x1x1x4x4xf32>
    %237 = vector.shape_cast %236 : vector<1x1x1x1x4x4xf32> to vector<4x4xf32>
    %238 = vector.shape_cast %235 : vector<4x4xf32> to vector<1x1x1x1x4x4xf32>
    tpu.vector_store %arg5[%c0_339, %c2_340, %c3_341, %c0_342, %c0_343, %c0_344], %238 {strides = array<i32>} : memref<1x4x4x4x4x4xf32, #tpu.memory_space<vmem>>, vector<1x1x1x1x4x4xf32>,
    %239 = vector.extract_strided_slice %202 {offsets = [0, 36], sizes = [4, 4], strides = [1, 1]} : vector<4x64xf32> to vector<4x4xf32>
    %c0_345 = arith.constant 0 : index
    %c2_346 = arith.constant 2 : index
    %c3_347 = arith.constant 3 : index
    %c1_348 = arith.constant 1 : index
    %c0_349 = arith.constant 0 : index
    %c0_350 = arith.constant 0 : index
    %240 = vector.load %arg5[%c0_345, %c2_346, %c3_347, %c1_348, %c0_349, %c0_350] : memref<1x4x4x4x4x4xf32, #tpu.memory_space<vmem>>, vector<1x1x1x1x4x4xf32>
    %241 = vector.shape_cast %240 : vector<1x1x1x1x4x4xf32> to vector<4x4xf32>
    %242 = vector.shape_cast %239 : vector<4x4xf32> to vector<1x1x1x1x4x4xf32>
    tpu.vector_store %arg5[%c0_345, %c2_346, %c3_347, %c1_348, %c0_349, %c0_350], %242 {strides = array<i32>} : memref<1x4x4x4x4x4xf32, #tpu.memory_space<vmem>>, vector<1x1x1x1x4x4xf32>,
    %243 = vector.extract_strided_slice %202 {offsets = [0, 40], sizes = [4, 4], strides = [1, 1]} : vector<4x64xf32> to vector<4x4xf32>
    %c0_351 = arith.constant 0 : index
    %c2_352 = arith.constant 2 : index
    %c3_353 = arith.constant 3 : index
    %c2_354 = arith.constant 2 : index
    %c0_355 = arith.constant 0 : index
    %c0_356 = arith.constant 0 : index
    %244 = vector.load %arg5[%c0_351, %c2_352, %c3_353, %c2_354, %c0_355, %c0_356] : memref<1x4x4x4x4x4xf32, #tpu.memory_space<vmem>>, vector<1x1x1x1x4x4xf32>
    %245 = vector.shape_cast %244 : vector<1x1x1x1x4x4xf32> to vector<4x4xf32>
    %246 = vector.shape_cast %243 : vector<4x4xf32> to vector<1x1x1x1x4x4xf32>
    tpu.vector_store %arg5[%c0_351, %c2_352, %c3_353, %c2_354, %c0_355, %c0_356], %246 {strides = array<i32>} : memref<1x4x4x4x4x4xf32, #tpu.memory_space<vmem>>, vector<1x1x1x1x4x4xf32>,
    %247 = vector.extract_strided_slice %202 {offsets = [0, 44], sizes = [4, 4], strides = [1, 1]} : vector<4x64xf32> to vector<4x4xf32>
    %c0_357 = arith.constant 0 : index
    %c2_358 = arith.constant 2 : index
    %c3_359 = arith.constant 3 : index
    %c3_360 = arith.constant 3 : index
    %c0_361 = arith.constant 0 : index
    %c0_362 = arith.constant 0 : index
    %248 = vector.load %arg5[%c0_357, %c2_358, %c3_359, %c3_360, %c0_361, %c0_362] : memref<1x4x4x4x4x4xf32, #tpu.memory_space<vmem>>, vector<1x1x1x1x4x4xf32>
    %249 = vector.shape_cast %248 : vector<1x1x1x1x4x4xf32> to vector<4x4xf32>
    %250 = vector.shape_cast %247 : vector<4x4xf32> to vector<1x1x1x1x4x4xf32>
    tpu.vector_store %arg5[%c0_357, %c2_358, %c3_359, %c3_360, %c0_361, %c0_362], %250 {strides = array<i32>} : memref<1x4x4x4x4x4xf32, #tpu.memory_space<vmem>>, vector<1x1x1x1x4x4xf32>,
    %251 = vector.extract_strided_slice %202 {offsets = [0, 48], sizes = [4, 4], strides = [1, 1]} : vector<4x64xf32> to vector<4x4xf32>
    %c0_363 = arith.constant 0 : index
    %c3_364 = arith.constant 3 : index
    %c3_365 = arith.constant 3 : index
    %c0_366 = arith.constant 0 : index
    %c0_367 = arith.constant 0 : index
    %c0_368 = arith.constant 0 : index
    %252 = vector.load %arg5[%c0_363, %c3_364, %c3_365, %c0_366, %c0_367, %c0_368] : memref<1x4x4x4x4x4xf32, #tpu.memory_space<vmem>>, vector<1x1x1x1x4x4xf32>
    %253 = vector.shape_cast %252 : vector<1x1x1x1x4x4xf32> to vector<4x4xf32>
    %254 = vector.shape_cast %251 : vector<4x4xf32> to vector<1x1x1x1x4x4xf32>
    tpu.vector_store %arg5[%c0_363, %c3_364, %c3_365, %c0_366, %c0_367, %c0_368], %254 {strides = array<i32>} : memref<1x4x4x4x4x4xf32, #tpu.memory_space<vmem>>, vector<1x1x1x1x4x4xf32>,
    %255 = vector.extract_strided_slice %202 {offsets = [0, 52], sizes = [4, 4], strides = [1, 1]} : vector<4x64xf32> to vector<4x4xf32>
    %c0_369 = arith.constant 0 : index
    %c3_370 = arith.constant 3 : index
    %c3_371 = arith.constant 3 : index
    %c1_372 = arith.constant 1 : index
    %c0_373 = arith.constant 0 : index
    %c0_374 = arith.constant 0 : index
    %256 = vector.load %arg5[%c0_369, %c3_370, %c3_371, %c1_372, %c0_373, %c0_374] : memref<1x4x4x4x4x4xf32, #tpu.memory_space<vmem>>, vector<1x1x1x1x4x4xf32>
    %257 = vector.shape_cast %256 : vector<1x1x1x1x4x4xf32> to vector<4x4xf32>
    %258 = vector.shape_cast %255 : vector<4x4xf32> to vector<1x1x1x1x4x4xf32>
    tpu.vector_store %arg5[%c0_369, %c3_370, %c3_371, %c1_372, %c0_373, %c0_374], %258 {strides = array<i32>} : memref<1x4x4x4x4x4xf32, #tpu.memory_space<vmem>>, vector<1x1x1x1x4x4xf32>,
    %259 = vector.extract_strided_slice %202 {offsets = [0, 56], sizes = [4, 4], strides = [1, 1]} : vector<4x64xf32> to vector<4x4xf32>
    %c0_375 = arith.constant 0 : index
    %c3_376 = arith.constant 3 : index
    %c3_377 = arith.constant 3 : index
    %c2_378 = arith.constant 2 : index
    %c0_379 = arith.constant 0 : index
    %c0_380 = arith.constant 0 : index
    %260 = vector.load %arg5[%c0_375, %c3_376, %c3_377, %c2_378, %c0_379, %c0_380] : memref<1x4x4x4x4x4xf32, #tpu.memory_space<vmem>>, vector<1x1x1x1x4x4xf32>
    %261 = vector.shape_cast %260 : vector<1x1x1x1x4x4xf32> to vector<4x4xf32>
    %262 = vector.shape_cast %259 : vector<4x4xf32> to vector<1x1x1x1x4x4xf32>
    tpu.vector_store %arg5[%c0_375, %c3_376, %c3_377, %c2_378, %c0_379, %c0_380], %262 {strides = array<i32>} : memref<1x4x4x4x4x4xf32, #tpu.memory_space<vmem>>, vector<1x1x1x1x4x4xf32>,
    %263 = vector.extract_strided_slice %202 {offsets = [0, 60], sizes = [4, 4], strides = [1, 1]} : vector<4x64xf32> to vector<4x4xf32>
    %c0_381 = arith.constant 0 : index
    %c3_382 = arith.constant 3 : index
    %c3_383 = arith.constant 3 : index
    %c3_384 = arith.constant 3 : index
    %c0_385 = arith.constant 0 : index
    %c0_386 = arith.constant 0 : index
    %264 = vector.load %arg5[%c0_381, %c3_382, %c3_383, %c3_384, %c0_385, %c0_386] : memref<1x4x4x4x4x4xf32, #tpu.memory_space<vmem>>, vector<1x1x1x1x4x4xf32>
    %265 = vector.shape_cast %264 : vector<1x1x1x1x4x4xf32> to vector<4x4xf32>
    %266 = vector.shape_cast %263 : vector<4x4xf32> to vector<1x1x1x1x4x4xf32>
    tpu.vector_store %arg5[%c0_381, %c3_382, %c3_383, %c3_384, %c0_385, %c0_386], %266 {strides = array<i32>} : memref<1x4x4x4x4x4xf32, #tpu.memory_space<vmem>>, vector<1x1x1x1x4x4xf32>,
    return
  }
  func.func @transform_0(%arg0: i32, %arg1: i32) -> (i32, i32, i32) {
    %c0_i32 = arith.constant 0 : i32
    %c0_i32_0 = arith.constant 0 : i32
    return %arg0, %arg1, %c0_i32 : i32, i32, i32
  }
  func.func @transform_1(%arg0: i32, %arg1: i32) -> (i32, i32) {
    %c0_i32 = arith.constant 0 : i32
    %c0_i32_0 = arith.constant 0 : i32
    %c0_i32_1 = arith.constant 0 : i32
    return %c0_i32, %c0_i32_0 : i32, i32
  }
  func.func @transform_2(%arg0: i32, %arg1: i32) -> (i32, i32) {
    %c0_i32 = arith.constant 0 : i32
    %c0_i32_0 = arith.constant 0 : i32
    %c0_i32_1 = arith.constant 0 : i32
    return %c0_i32, %c0_i32_0 : i32, i32
  }
  func.func @transform_3(%arg0: i32, %arg1: i32) -> (i32, i32, i32, i32, i32, i32) {
    %c0_i32 = arith.constant 0 : i32
    %c0_i32_0 = arith.constant 0 : i32
    %c0_i32_1 = arith.constant 0 : i32
    %c0_i32_2 = arith.constant 0 : i32
    %c0_i32_3 = arith.constant 0 : i32
    return %arg0, %c0_i32, %arg1, %c0_i32_0, %c0_i32_1, %c0_i32_2 : i32, i32, i32, i32, i32, i32
  }
}

</mosaic_0001>

<bundles_post_ra>
// kernel: _unpatchify_forward.1
= control target key start
LH: loop header
LB: loop body
LE: loop exit
PB: predicated region body
PF: predicated region fallthrough
CT: control target
= control target key end

     0   :  { %8 = vsyncpa [#allocation3], 0  ;;  %s1306_s0 = inlined_call_operand.hbm [shape: f32[2,16,32], index: 0, kind: input, shape index: {}]   ;;  %s1307_s1 = inlined_call_operand.hbm [shape: f32[32,64], index: 1, kind: input, shape index: {}]   ;;  %s1308_s2 = inlined_call_operand.vmem [shape: f32[1,64], index: 2, kind: input, shape index: {}]   ;;  %s1309_s3 = inlined_call_operand.vmem [shape: f32[2,4,4,4,4,4], index: 3, kind: output, shape index: {}]  }
   0x1   :  { %10 = vsyncpa [#allocation3 + $0x1], 0 }
   0x2   :  { %11 = vsyncpa [#allocation5], 0  ;;  %s1007_s12 = smov 0   ;;  %s1009_s13 = smov 0  }
   0x3   :  { %s1011_s14 = smov 0   ;;  %s1013_s15 = smov 0  }
   0x4   :  { %s1015_s16 = smov 0   ;;  %s1017_s17 = smov 0  }
   0x5 LB: > { %s663_s18 = sadd.s32 4294967295, %s966_s17   ;;  %p51_p0 = scmp.ne.s32.totalorder %s950_s13, %s946_s12  ;;  %s966_s17 = sphi %s1017_s17, %s17_s17   ;;  %s962_s16 = sphi %s1015_s16, %s1326_s16   ;;  %s958_s15 = sphi %s1013_s15, %s1325_s15   ;;  %s954_s14 = sphi %s1011_s14, %s1324_s14   ;;  %s950_s13 = sphi %s1009_s13, %s1323_s13   ;;  %s946_s12 = sphi %s1007_s12, %s1322_s12  }
   0x6   : > { %p1037_p1 = scmp.eq.s32.totalorder %s663_s18, 0  ;;  %p665_p2 = scmp.ge.s32.totalorder %s966_s17, 1 }
   0x7   : > { %p132_p3 = scmp.lt.s32.totalorder %s966_s17, 3  ;;  %s968_s22 = smov [#allocation4]  }
   0x8   : > { %s1314_s19 = scalar_select %p1037_p1, 1, 0 }
   0x9   : > { %p1045_p4 = por %p1037_p1, %p51_p0  ;;  %p1049_p5 = pnand %p665_p2, %p132_p3 }
   0xa   : > { %s144_s23 = sshll.u32 %s968_s22, 4  ;;  %s29_s25 = sadd.s32 1, %s962_s16  ;;  %s145_s23 = int_to_ptr.vmem [resolvable:$true] %s144_s23 }
   0xb   : > { %s1315_s20 = scalar_select %p1045_p4, 1, 0 }
   0xc   : > { %s1316_s21 = scalar_select %p1049_p5, 1, 0 }
   0xd   : > { %p777_p6 = pneg %p1049_p5  ;;  %s854_s28 = scalar_lea.hbm %s1307_s1, 512 }
   0xe   : > { %p855_p8 = scmp.ne.s32.totalorder %s1307_s1, %s854_s28  ;;  %p861_p12 = scmp.lt.u32.totalorder %s854_s28, %s1307_s1 }
   0xf   : > { %p1057_p7 = pnand %p777_p6, %p1037_p1 }
  0x11   : > { %p856_p9 = pneg %p1057_p7 }
  0x13   : > { %p857_p10 = pnand %p856_p9, %p855_p8 }
  0x15   : > { %p858_p11 = pneg %p857_p10 }
  0x17   : > { %p863_p13 = pnand %p861_p12, %p858_p11 }
  0x19   : > { %866 = shalt.err (!%p863_p13)
}
  0x1a   : > { %s867_s6 = scalar_lea.vmem %s145_s23, 512  ;;  %p875_p6 = scmp.lt.s32.totalorder %s145_s23, %s145_s23 }
  0x1b   : > { %p868_p0 = scmp.ne.s32.totalorder %s145_s23, %s867_s6  ;;  %p876_p1 = scmp.lt.s32.totalorder %s867_s6, %s867_s6 }
  0x1d   : > { %p870_p2 = pnand %p868_p0, %p856_p9  ;;  %p877_p4 = por %p876_p1, %p875_p6 }
  0x1f   : > { %p871_p3 = pneg %p870_p2 }
  0x21   : > { %p878_p5 = pnand %p877_p4, %p871_p3 }
  0x23   : > { %881 = shalt.err (!%p878_p5)
}
  0x24   : > { %s969_s7 = smov 128   ;;  %s970_s8 = smov 8  }
  0x25   : > { %780 = dma.hbm_to_vmem [thread:$0]  (!%p1057_p7), %s1307_s1, 512, %s145_s23, [#allocation5], %s969_s7, %s969_s7, %s970_s8  }
  0x26   : > { %p31_p1 = scmp.ge.s32.totalorder %s29_s25, 2  ;;  %s38_s11 = sadd.s32 1, %s954_s14 }
  0x27   : > { %p45_p4 = scmp.ne.s32.totalorder %s954_s14, %s950_s13  ;;  %p46_p5 = scmp.eq.s32.totalorder %s966_s17, 0 }
  0x28   : > { %s1328_s25 = smov (%p31_p1, %s29_s25), 0  ;;  %p786_p9 = scmp.lt.s32.totalorder %s966_s17, 2 }
  0x29   : > { %p47_p8 = por %p46_p5, %p45_p4  ;;  %s33_s12 = ssub.s32 %s962_s16, %s1328_s25 }
  0x2a   : > { %s161_s18 = sand.u32 1, %s954_s14   ;;  %p36_p10 = scmp.eq.s32.totalorder %s33_s12, 0 }
  0x2b   : > { %s668_s22 = sshll.u32 %s161_s18, 4  ;;  %s744_s24 = sshll.u32 %s962_s16, 8 }
  0x2c   : > { %s1093_s26 = scalar_select %p36_p10, %s954_s14, %s38_s11  }
  0x2d   : > { %s1098_s23 = scalar_lea.hbm %s1306_s0, %s744_s24  ;;  %s165_s29 = scalar_lea.vmem [#allocation2], %s668_s22 }
  0x2e   : > { %s174_s30 = sshll.u32 %s165_s29, 4  ;;  %p1100_p7 = pnand %p786_p9, %p47_p8  ;;  %s1104_s30 = int_to_ptr.vmem [resolvable:$true] %s174_s30 }
  0x2f   : > { %s1106_s5 = scalar_lea.sflag [#allocation3], %s161_s18  ;;  %s882_s6 = scalar_lea.hbm %s1098_s23, 256 }
  0x30   : > { %p883_p11 = scmp.ne.s32.totalorder %s1098_s23, %s882_s6  ;;  %p884_p12 = pneg %p1100_p7 }
  0x31   : > { %s887_s11 = scalar_lea.hbm %s1306_s0, 512  ;;  %p888_p2 = scmp.lt.u32.totalorder %s1098_s23, %s1306_s0 }
  0x32   : > { %p885_p13 = pnand %p884_p12, %p883_p11  ;;  %p889_p3 = scmp.lt.u32.totalorder %s887_s11, %s882_s6 }
  0x33   : > { %p891_p1 = scmp.lt.u32.totalorder %s882_s6, %s1098_s23 }
  0x34   : > { %p886_p0 = pneg %p885_p13  ;;  %p890_p6 = por %p889_p3, %p888_p2 }
  0x36   : > { %p892_p4 = por %p891_p1, %p890_p6 }
  0x38   : > { %p893_p5 = pnand %p892_p4, %p886_p0 }
  0x3a   : > { %896 = shalt.err (!%p893_p5)
}
  0x3b   : > { %s897_s18 = scalar_lea.vmem %s1104_s30, 256  ;;  %s971_s24 = smov [#allocation2]  }
  0x3c   : > { %p898_p8 = scmp.ne.s32.totalorder %s1104_s30, %s897_s18  ;;  %s902_s27 = sshll.u32 %s971_s24, 4  ;;  %s903_s27 = int_to_ptr.vmem [resolvable:$false] %s902_s27 }
  0x3d   : > { %s904_s28 = scalar_lea.vmem %s903_s27, 512  ;;  %p905_p11 = scmp.lt.s32.totalorder %s1104_s30, %s903_s27 }
  0x3e   : > { %p900_p9 = pnand %p898_p8, %p884_p12  ;;  %p906_p13 = scmp.lt.s32.totalorder %s904_s28, %s897_s18 }
  0x40   : > { %p901_p10 = pneg %p900_p9  ;;  %p907_p2 = por %p906_p13, %p905_p11 }
  0x42   : > { %p908_p3 = pnand %p907_p2, %p901_p10 }
  0x44   : > { %911 = shalt.err (!%p908_p3)
}
  0x45   : > { %784 = dma.hbm_to_vmem [thread:$0]  (!%p1100_p7), %s1098_s23, 256, %s1104_s30, %s1106_s5, %s969_s7, %s969_s7, %s970_s8  }
  0x46   : > { %p1319_p12 = scmp.ne.s32.totalorder %s1316_s21, 0 }
  0x47   : > { %s188_s29 = sand.u32 (!%p1319_p12), 1, %s950_s13   ;;  %p1320_p0 = scmp.ne.s32.totalorder (!%p1319_p12), %s1315_s20, 0 }
  0x48   : > { %186 = sbr.rel (%p1319_p12) target bundleno = 481 (0x1e1), region = 32  ;;  %s672_s6 = sshll.u32 (!%p1319_p12), %s188_s29, 4 }
  0x49   : > { %s189_s9 = scalar_lea.sflag (!%p1319_p12), [#allocation3], %s188_s29  ;;  %s192_s10 = scalar_lea.vmem (!%p1319_p12), [#allocation2], %s672_s6 }
  0x4f   : > { %937 = dma.done.wait (%p1320_p0), %s189_s9, 256  }
  0x50   : > { %939 = vsyncadd (%p1320_p0), %s189_s9, 4294967040  ;;  %p1321_p6 = scmp.ne.s32.totalorder %s1314_s19, 0 }
  0x52   : > { %941 = dma.done.wait (%p1321_p6), [#allocation5], 512  }
  0x53   : > { %943 = vsyncadd (%p1321_p6), [#allocation5], 4294966784  ;;  %vm249_vm0 = vcmask 261120   ;;  %v238_v0 = vld [vmem:[#allocation4] sm:$0xff]  ;;  %v239_v1 = vld [vmem:[#allocation4 + $0x8] sm:$0xff]  ;;  %p226_p7 = scmp.lt.s32.totalorder %s958_s15, 1 }
  0x54   : > { %v240_v2 = vld [vmem:[#allocation4 + $0x10] sm:$0xff]  ;;  %v763_v3 = vpack.c.bf16 %v239_v1, %v238_v0  ;;  %v241_v4 = vld [vmem:[#allocation4 + $0x18] sm:$0xff]  ;;  %v676_v8 = vld [vmem:[%s1308_s2] ss:$0 sm:$0xff]  ;;  %vm331_vm1 = vcmask 27648   ;;  %vm410_vm2 = vcmask 31748  }
  0x55   : > { %v236_v5 = vld [vmem:[%s192_s10] sm:$0xff]  ;;  %v767_v6 = vpack.c.bf16 %v241_v4, %v240_v2  ;;  %v237_v7 = vld [vmem:[%s192_s10 + $0x8] sm:$0xff]  ;;  %s1330_s15 = smov (!%p226_p7, %s958_s15), 1  ;;  %s973_s30 = smov 124  }
  0x56   : > { %760 = vmatprep.mubr.msk.f32.mxu0 %vm249_vm0, %v236_v5  ;;  %764 = vmatprep.subr.bf16.mxu0 %v763_v3  ;;  %s745_s19 = sshll.u32 %s1330_s15, 8  ;;  %s972_s15 = smov 120  }
  0x57   : > { %766 = vmatpush3.bf16.msra.mxu0 %v763_v3  ;;  %s1156_s23 = scalar_lea.vmem %s1309_s3, %s745_s19  ;;  %s974_s4 = smov 112  }
  0x58   : > { %768 = vmatprep.subr.bf16.mxu0 %v767_v6  ;;  %s975_s5 = smov 116   ;;  %s976_s11 = smov 104  }
  0x59   : > { %s977_s12 = smov 108   ;;  %s978_s22 = smov 96  }
  0x5a   : > { %s979_s18 = smov 100   ;;  %s980_s24 = smov 88  }
  0x5b   : > { %770 = vmatpush3.bf16.msra.mxu0 %v767_v6  ;;  %s981_s27 = smov 92   ;;  %s982_s28 = smov 80  }
  0x5c   : > { %s983_s29 = smov 84   ;;  %s984_s6 = smov 76  }
  0x5d   : > { %s985_s9 = smov 72   ;;  %s986_s10 = smov 68  }
  0x5e   : > { %761 = vmatmul.mubr.msk.f32.vlgmr.msra.gmra.mrb[0].mxu0 %vm249_vm0, %v237_v7 }
 0x131   : > { %v762_v9 = vpop.f32.mrb[0].mxu0 }
 0x132   : > { %v328_v10 = vadd.f32 %v762_v9, %v676_v8  ;;  %v322_v11 = vpop.f32.mrb[1].mxu0 }
 0x133   : > { %v323_v12 = vadd.f32 %v676_v8, %v322_v11 }
 0x134   : > { %710 = vst.msk [vmem:[%s1156_s23 + $0x20] sm:$0xf] %vm331_vm1, %v328_v10  ;;  %450 = vrot.lane.b32.xlu0 %v328_v10, %s972_s15  ;;  %445 = vrot.lane.b32.xlu1 %v328_v10, %s973_s30 }
 0x135   : > { %726 = vst.msk [vmem:[%s1156_s23 + $0x2c] sm:$0xf0] %vm410_vm2, %v328_v10  ;;  %694 = vst.msk [vmem:[%s1156_s23 + $0xc] sm:$0xf0] %vm410_vm2, %v323_v12 }
 0x136   : > { %332 = vst.msk [vmem:[%s1156_s23] sm:$0xf] %vm331_vm1, %v323_v12 }
 0x138   : > { %460 = vrot.lane.b32.xlu0 %v328_v10, %s974_s4  ;;  %455 = vrot.lane.b32.xlu1 %v328_v10, %s975_s5 }
 0x13c   : > { %470 = vrot.lane.b32.xlu0 %v328_v10, %s976_s11  ;;  %465 = vrot.lane.b32.xlu1 %v328_v10, %s977_s12 }
 0x140   : > { %480 = vrot.lane.b32.xlu0 %v328_v10, %s978_s22  ;;  %475 = vrot.lane.b32.xlu1 %v328_v10, %s979_s18 }
 0x144   : > { %490 = vrot.lane.b32.xlu0 %v328_v10, %s980_s24  ;;  %485 = vrot.lane.b32.xlu1 %v328_v10, %s981_s27 }
 0x148   : > { %500 = vrot.lane.b32.xlu0 %v328_v10, %s982_s28  ;;  %495 = vrot.lane.b32.xlu1 %v328_v10, %s983_s29 }
 0x14c   : > { %505 = vrot.lane.b32.xlu1 %v328_v10, %s984_s6  ;;  %334 = vrot.lane.b32.xlu0 %v323_v12, %s973_s30 }
 0x150   : > { %344 = vrot.lane.b32.xlu1 %v323_v12, %s975_s5  ;;  %339 = vrot.lane.b32.xlu0 %v323_v12, %s972_s15 }
 0x154   : > { %349 = vrot.lane.b32.xlu1 %v323_v12, %s974_s4  ;;  %354 = vrot.lane.b32.xlu0 %v323_v12, %s977_s12 }
 0x158   : > { %359 = vrot.lane.b32.xlu1 %v323_v12, %s976_s11  ;;  %364 = vrot.lane.b32.xlu0 %v323_v12, %s979_s18 }
 0x15c   : > { %369 = vrot.lane.b32.xlu1 %v323_v12, %s978_s22  ;;  %374 = vrot.lane.b32.xlu0 %v323_v12, %s981_s27 }
 0x160   : > { %379 = vrot.lane.b32.xlu1 %v323_v12, %s980_s24  ;;  %384 = vrot.lane.b32.xlu0 %v323_v12, %s983_s29 }
 0x164   : > { %389 = vrot.lane.b32.xlu1 %v323_v12, %s982_s28  ;;  %394 = vrot.lane.b32.xlu0 %v323_v12, %s984_s6 }
 0x168   : > { %399 = vrot.lane.b32.xlu1 %v323_v12, %s985_s9  ;;  %404 = vrot.lane.b32.xlu0 %v323_v12, %s986_s10 }
 0x16c   : > { %515 = vrot.lane.b32.xlu1 %v328_v10, %s986_s10  ;;  %510 = vrot.lane.b32.xlu0 %v328_v10, %s985_s9 }
 0x1a6   : > { %v451_v13 = vpop.permute.xlu0 %450  ;;  %v446_v14 = vpop.permute.xlu1 %445 }
 0x1a7   : > { %712 = vst.msk [vmem:[%s1156_s23 + $0x28] sm:$0xf] %vm331_vm1, %v451_v13  ;;  %711 = vst.msk [vmem:[%s1156_s23 + $0x24] sm:$0xf] %vm331_vm1, %v446_v14 }
 0x1a8   : > { %728 = vst.msk [vmem:[%s1156_s23 + $0x34] sm:$0xf0] %vm410_vm2, %v451_v13  ;;  %727 = vst.msk [vmem:[%s1156_s23 + $0x30] sm:$0xf0] %vm410_vm2, %v446_v14 }
 0x1aa   : > { %v461_v15 = vpop.permute.xlu0 %460  ;;  %v456_v16 = vpop.permute.xlu1 %455 }
 0x1ab   : > { %714 = vst.msk [vmem:[%s1156_s23 + $0x60] sm:$0xf] %vm331_vm1, %v461_v15  ;;  %713 = vst.msk [vmem:[%s1156_s23 + $0x2c] sm:$0xf] %vm331_vm1, %v456_v16 }
 0x1ac   : > { %730 = vst.msk [vmem:[%s1156_s23 + $0x6c] sm:$0xf0] %vm410_vm2, %v461_v15  ;;  %729 = vst.msk [vmem:[%s1156_s23 + $0x38] sm:$0xf0] %vm410_vm2, %v456_v16 }
 0x1ae   : > { %v471_v17 = vpop.permute.xlu0 %470  ;;  %v466_v18 = vpop.permute.xlu1 %465 }
 0x1af   : > { %716 = vst.msk [vmem:[%s1156_s23 + $0x68] sm:$0xf] %vm331_vm1, %v471_v17  ;;  %715 = vst.msk [vmem:[%s1156_s23 + $0x64] sm:$0xf] %vm331_vm1, %v466_v18 }
 0x1b0   : > { %732 = vst.msk [vmem:[%s1156_s23 + $0x74] sm:$0xf0] %vm410_vm2, %v471_v17  ;;  %731 = vst.msk [vmem:[%s1156_s23 + $0x70] sm:$0xf0] %vm410_vm2, %v466_v18 }
 0x1b2   : > { %v481_v19 = vpop.permute.xlu0 %480  ;;  %v476_v20 = vpop.permute.xlu1 %475 }
 0x1b3   : > { %718 = vst.msk [vmem:[%s1156_s23 + $0xa0] sm:$0xf] %vm331_vm1, %v481_v19  ;;  %717 = vst.msk [vmem:[%s1156_s23 + $0x6c] sm:$0xf] %vm331_vm1, %v476_v20 }
 0x1b4   : > { %734 = vst.msk [vmem:[%s1156_s23 + $0xac] sm:$0xf0] %vm410_vm2, %v481_v19  ;;  %733 = vst.msk [vmem:[%s1156_s23 + $0x78] sm:$0xf0] %vm410_vm2, %v476_v20 }
 0x1b6   : > { %v491_v21 = vpop.permute.xlu0 %490  ;;  %v486_v22 = vpop.permute.xlu1 %485 }
 0x1b7   : > { %720 = vst.msk [vmem:[%s1156_s23 + $0xa8] sm:$0xf] %vm331_vm1, %v491_v21  ;;  %719 = vst.msk [vmem:[%s1156_s23 + $0xa4] sm:$0xf] %vm331_vm1, %v486_v22 }
 0x1b8   : > { %736 = vst.msk [vmem:[%s1156_s23 + $0xb4] sm:$0xf0] %vm410_vm2, %v491_v21  ;;  %735 = vst.msk [vmem:[%s1156_s23 + $0xb0] sm:$0xf0] %vm410_vm2, %v486_v22 }
 0x1ba   : > { %v501_v23 = vpop.permute.xlu0 %500  ;;  %v496_v24 = vpop.permute.xlu1 %495 }
 0x1bb   : > { %722 = vst.msk [vmem:[%s1156_s23 + $0xe0] sm:$0xf] %vm331_vm1, %v501_v23  ;;  %721 = vst.msk [vmem:[%s1156_s23 + $0xac] sm:$0xf] %vm331_vm1, %v496_v24 }
 0x1bc   : > { %738 = vst.msk [vmem:[%s1156_s23 + $0xec] sm:$0xf0] %vm410_vm2, %v501_v23  ;;  %737 = vst.msk [vmem:[%s1156_s23 + $0xb8] sm:$0xf0] %vm410_vm2, %v496_v24 }
 0x1be   : > { %v506_v25 = vpop.permute.xlu1 %505  ;;  %v335_v26 = vpop.permute.xlu0 %334 }
 0x1bf   : > { %723 = vst.msk [vmem:[%s1156_s23 + $0xe4] sm:$0xf] %vm331_vm1, %v506_v25  ;;  %679 = vst.msk [vmem:[%s1156_s23 + $0x4] sm:$0xf] %vm331_vm1, %v335_v26 }
 0x1c0   : > { %739 = vst.msk [vmem:[%s1156_s23 + $0xf0] sm:$0xf0] %vm410_vm2, %v506_v25  ;;  %695 = vst.msk [vmem:[%s1156_s23 + $0x10] sm:$0xf0] %vm410_vm2, %v335_v26 }
 0x1c2   : > { %v345_v27 = vpop.permute.xlu1 %344  ;;  %v340_v28 = vpop.permute.xlu0 %339 }
 0x1c3   : > { %681 = vst.msk [vmem:[%s1156_s23 + $0xc] sm:$0xf] %vm331_vm1, %v345_v27  ;;  %680 = vst.msk [vmem:[%s1156_s23 + $0x8] sm:$0xf] %vm331_vm1, %v340_v28 }
 0x1c4   : > { %697 = vst.msk [vmem:[%s1156_s23 + $0x18] sm:$0xf0] %vm410_vm2, %v345_v27  ;;  %696 = vst.msk [vmem:[%s1156_s23 + $0x14] sm:$0xf0] %vm410_vm2, %v340_v28 }
 0x1c6   : > { %v350_v29 = vpop.permute.xlu1 %349  ;;  %v355_v30 = vpop.permute.xlu0 %354 }
 0x1c7   : > { %682 = vst.msk [vmem:[%s1156_s23 + $0x40] sm:$0xf] %vm331_vm1, %v350_v29  ;;  %683 = vst.msk [vmem:[%s1156_s23 + $0x44] sm:$0xf] %vm331_vm1, %v355_v30 }
 0x1c8   : > { %698 = vst.msk [vmem:[%s1156_s23 + $0x4c] sm:$0xf0] %vm410_vm2, %v350_v29  ;;  %699 = vst.msk [vmem:[%s1156_s23 + $0x50] sm:$0xf0] %vm410_vm2, %v355_v30 }
 0x1ca   : > { %v360_v31 = vpop.permute.xlu1 %359  ;;  %v365_v32 = vpop.permute.xlu0 %364 }
 0x1cb   : > { %684 = vst.msk [vmem:[%s1156_s23 + $0x48] sm:$0xf] %vm331_vm1, %v360_v31  ;;  %685 = vst.msk [vmem:[%s1156_s23 + $0x4c] sm:$0xf] %vm331_vm1, %v365_v32 }
 0x1cc   : > { %700 = vst.msk [vmem:[%s1156_s23 + $0x54] sm:$0xf0] %vm410_vm2, %v360_v31  ;;  %701 = vst.msk [vmem:[%s1156_s23 + $0x58] sm:$0xf0] %vm410_vm2, %v365_v32 }
 0x1ce   : > { %v370_v33 = vpop.permute.xlu1 %369  ;;  %v375_v34 = vpop.permute.xlu0 %374 }
 0x1cf   : > { %686 = vst.msk [vmem:[%s1156_s23 + $0x80] sm:$0xf] %vm331_vm1, %v370_v33  ;;  %687 = vst.msk [vmem:[%s1156_s23 + $0x84] sm:$0xf] %vm331_vm1, %v375_v34 }
 0x1d0   : > { %702 = vst.msk [vmem:[%s1156_s23 + $0x8c] sm:$0xf0] %vm410_vm2, %v370_v33  ;;  %703 = vst.msk [vmem:[%s1156_s23 + $0x90] sm:$0xf0] %vm410_vm2, %v375_v34 }
 0x1d2   : > { %v380_v35 = vpop.permute.xlu1 %379  ;;  %v385_v36 = vpop.permute.xlu0 %384 }
 0x1d3   : > { %688 = vst.msk [vmem:[%s1156_s23 + $0x88] sm:$0xf] %vm331_vm1, %v380_v35  ;;  %689 = vst.msk [vmem:[%s1156_s23 + $0x8c] sm:$0xf] %vm331_vm1, %v385_v36 }
 0x1d4   : > { %704 = vst.msk [vmem:[%s1156_s23 + $0x94] sm:$0xf0] %vm410_vm2, %v380_v35  ;;  %705 = vst.msk [vmem:[%s1156_s23 + $0x98] sm:$0xf0] %vm410_vm2, %v385_v36 }
 0x1d6   : > { %v390_v37 = vpop.permute.xlu1 %389  ;;  %v395_v38 = vpop.permute.xlu0 %394 }
 0x1d7   : > { %690 = vst.msk [vmem:[%s1156_s23 + $0xc0] sm:$0xf] %vm331_vm1, %v390_v37  ;;  %691 = vst.msk [vmem:[%s1156_s23 + $0xc4] sm:$0xf] %vm331_vm1, %v395_v38 }
 0x1d8   : > { %706 = vst.msk [vmem:[%s1156_s23 + $0xcc] sm:$0xf0] %vm410_vm2, %v390_v37  ;;  %707 = vst.msk [vmem:[%s1156_s23 + $0xd0] sm:$0xf0] %vm410_vm2, %v395_v38 }
 0x1da   : > { %v400_v39 = vpop.permute.xlu1 %399  ;;  %v405_v40 = vpop.permute.xlu0 %404 }
 0x1db   : > { %692 = vst.msk [vmem:[%s1156_s23 + $0xc8] sm:$0xf] %vm331_vm1, %v400_v39  ;;  %693 = vst.msk [vmem:[%s1156_s23 + $0xcc] sm:$0xf] %vm331_vm1, %v405_v40 }
 0x1dc   : > { %708 = vst.msk [vmem:[%s1156_s23 + $0xd4] sm:$0xf0] %vm410_vm2, %v400_v39  ;;  %709 = vst.msk [vmem:[%s1156_s23 + $0xd8] sm:$0xf0] %vm410_vm2, %v405_v40 }
 0x1de   : > { %v516_v41 = vpop.permute.xlu1 %515  ;;  %v511_v42 = vpop.permute.xlu0 %510 }
 0x1df   : > { %725 = vst.msk [vmem:[%s1156_s23 + $0xec] sm:$0xf] %vm331_vm1, %v516_v41  ;;  %724 = vst.msk [vmem:[%s1156_s23 + $0xe8] sm:$0xf] %vm331_vm1, %v511_v42 }
 0x1e0   : > { %741 = vst.msk [vmem:[%s1156_s23 + $0xf8] sm:$0xf0] %vm410_vm2, %v516_v41  ;;  %740 = vst.msk [vmem:[%s1156_s23 + $0xf4] sm:$0xf0] %vm410_vm2, %v511_v42 }
 0x1e1 PF: > { %s17_s17 = sadd.s32 1, %s966_s17   ;;  %s1322_s12 = smov %s950_s13 }
 0x1e2   : > { %p14_p1 = scmp.ge.s32.totalorder %s17_s17, 4   ;;  %s1323_s13 = smov %s954_s14 }
 0x1e3   : > { %s1324_s14 = smov %s1093_s26  ;;  %s1325_s15 = smov %s962_s16 }
 0x1e4   : > { %s1326_s16 = smov %s1328_s25  ;;  %16 = sbr.rel (!%p14_p1) target bundleno = 5 (0x5), region = 139 }
 0x1eb   :  { %584 = vsyncpa [#allocation3], 1 }
 0x1ec   :  { %586 = vsyncpa [#allocation3 + $0x1], 1 }
 0x1ed   :  { %587 = vsyncpa [#allocation5], 1 }

</bundles_post_ra>
